<compile_context>
chip_gen: v7x
topology: tpu7x:2x2x1
jax: 0.10.0
libtpu: 0.0.40
codegen_flags: <defaults>
</compile_context>

<pallas_src>
import math
import jax
import jax.numpy as jnp
from jax.experimental import pallas as pl
from jax.experimental.pallas import tpu as pltpu

FEATURE_DIM = 256
NUM_CLASSES = 11
PAD_CLASSES = 128            # lane-dense packed output width
AUX_LANE = (32, 64, 96)      # lane offsets of the three aux heads in the output
LN_EPS = 1e-5


# ---------------------------------------------------------------------------
# In-kernel math helpers (all in f32)
# ---------------------------------------------------------------------------
def _layernorm(h, gamma, beta):
    # Two-pass LN (matches nn.LayerNorm numerics).
    mu = jnp.mean(h, axis=-1, keepdims=True)
    c = h - mu
    var = jnp.mean(c * c, axis=-1, keepdims=True)
    return c * jax.lax.rsqrt(var + LN_EPS) * gamma + beta


def _gelu_exact(h):
    # nn.GELU() default is the exact erf formulation.
    return 0.5 * h * (1.0 + jax.lax.erf(h * (1.0 / math.sqrt(2.0))))


def _main_head(x, w1, w2, w3, vp256, vp128):
    """Linear->LN->GELU->Linear->LN->GELU->Linear (dropout = identity).

    The final bias (b3) is applied by the caller via the packed bias row.
    """
    b1, g1, be1 = vp256[0:1], vp256[1:2], vp256[2:3]
    b2, g2, be2 = vp128[0:1], vp128[1:2], vp128[2:3]
    wdt = w1.dtype          # weights may be bf16; LN/GELU math stays f32

    h = jnp.dot(x.astype(wdt), w1, preferred_element_type=jnp.float32) + b1
    h = _gelu_exact(_layernorm(h, g1, be1))
    h = jnp.dot(h.astype(wdt), w2, preferred_element_type=jnp.float32) + b2
    h = _gelu_exact(_layernorm(h, g2, be2))
    return jnp.dot(h.astype(wdt), w3, preferred_element_type=jnp.float32)


# ---------------------------------------------------------------------------
# Kernels
# ---------------------------------------------------------------------------
def fused_kernel(acts_ref, w1_ref, w2_ref, w3_ref, waux_ref,
                 vp256_ref, vp128_ref, out_ref):
    """Main classifier head + 3 aux heads -> one packed 128-lane output."""
    vp256 = vp256_ref[...]                     # (3, 256): b1, g1, be1
    vp128 = vp128_ref[...]                     # (4, 128): b2, g2, be2, bfin
    bfin = vp128[3:4]                          # packed b3|b24|b77|bx bias row

    main = _main_head(acts_ref[:, 0:FEATURE_DIM],
                      w1_ref[...], w2_ref[...], w3_ref[...], vp256, vp128)
    # (tm, 768) @ block-diagonal (768, 128): each aux head lands in its lanes.
    aux = jnp.dot(acts_ref[:, FEATURE_DIM:4 * FEATURE_DIM].astype(w1_ref.dtype),
                  waux_ref[...], preferred_element_type=jnp.float32)
    out_ref[...] = (main + aux + bfin).astype(out_ref.dtype)


def main_only_kernel(x_ref, w1_ref, w2_ref, w3_ref, vp256_ref, vp128_ref,
                     out_ref):
    """Used when the aux features are not provided (aux_outputs is None)."""
    vp128 = vp128_ref[...]
    bfin = vp128[3:4]                          # only lanes 0:11 (b3) are used
    main = _main_head(x_ref[...], w1_ref[...], w2_ref[...], w3_ref[...],
                      vp256_ref[...], vp128)
    out_ref[...] = (main + bfin).astype(out_ref.dtype)


# ---------------------------------------------------------------------------
# Parameter preparation (padding / packing, done once outside the kernel)
# ---------------------------------------------------------------------------
def prepare_params(params, weights_dtype=jnp.bfloat16):
    """Pack weights/biases for the fused kernel.

    - w3 padded to (128, 128): logits at lanes 0:11.
    - Aux heads packed block-diagonally into (768, 128): w24 -> lanes 32:43,
      w77 -> lanes 64:75, wx -> lanes 96:107.
    - All biases / LN params stay f32 (packed into (3,256) and (4,128)).
    """
    assert NUM_CLASSES <= 32
    d, nc = FEATURE_DIM, NUM_CLASSES

    w3p = jnp.zeros((d // 2, PAD_CLASSES), jnp.float32)
    w3p = w3p.at[:, :nc].set(params["w3"])

    waux = jnp.zeros((3 * d, PAD_CLASSES), jnp.float32)
    waux = waux.at[0 * d:1 * d, AUX_LANE[0]:AUX_LANE[0] + nc].set(params["w24"])
    waux = waux.at[1 * d:2 * d, AUX_LANE[1]:AUX_LANE[1] + nc].set(params["w77"])
    waux = waux.at[2 * d:3 * d, AUX_LANE[2]:AUX_LANE[2] + nc].set(params["wx"])

    bfin = jnp.zeros((1, PAD_CLASSES), jnp.float32)
    bfin = bfin.at[:, 0:nc].set(params["b3"])
    bfin = bfin.at[:, AUX_LANE[0]:AUX_LANE[0] + nc].set(params["b24"])
    bfin = bfin.at[:, AUX_LANE[1]:AUX_LANE[1] + nc].set(params["b77"])
    bfin = bfin.at[:, AUX_LANE[2]:AUX_LANE[2] + nc].set(params["bx"])

    return {
        "w1": params["w1"].astype(weights_dtype),        # (256, 256)
        "w2": params["w2"].astype(weights_dtype),         # (256, 128)
        "w3": w3p.astype(weights_dtype),                  # (128, 128)
        "waux": waux.astype(weights_dtype),               # (768, 128) block-diag
        "vp256": jnp.concatenate(
            [params["b1"], params["g1"], params["be1"]], axis=0),   # (3, 256)
        "vp128": jnp.concatenate(
            [params["b2"], params["g2"], params["be2"], bfin], axis=0),  # (4,128)
    }


# ---------------------------------------------------------------------------
# Wrapper mirroring AdaptiveClassifier.forward (inference mode)
# ---------------------------------------------------------------------------
def _cdiv(a, b):
    return -(-a // b)


def _round_up(n, m):
    return _cdiv(n, m) * m


def _choose_tile(batch, block_rows, row_align=16):
    """Balanced batch tiles; >=2 tiles when possible so v7x uses both TCs."""
    n_tiles = max(1, _cdiv(batch, block_rows))
    if batch >= 2 * row_align and n_tiles < 2:
        n_tiles = 2
    tm = _round_up(_cdiv(batch, n_tiles), row_align)
    b_pad = _round_up(batch, tm)
    return tm, b_pad


def _const_spec(a):
    # Full-array block, constant index -> fetched once, resident across grid.
    return pl.BlockSpec(a.shape, lambda i: (0, 0))


def adaptive_classifier_forward(x, packed, f24=None, f77=None, fx=None, *,
                                block_rows=1024, act_dtype=jnp.bfloat16,
                                out_dtype=jnp.float32):
    have_aux = f24 is not None and f77 is not None and fx is not None
    B = x.shape[0]
    tm, b_pad = _choose_tile(B, block_rows)
    grid = (b_pad // tm,)

    if have_aux:
        # Single (B, 1024) activation slab -> one DMA stream per grid step.
        acts = jnp.concatenate([x, f24, f77, fx], axis=-1).astype(act_dtype)
        consts = (packed["w1"], packed["w2"], packed["w3"], packed["waux"],
                  packed["vp256"], packed["vp128"])
        kernel = fused_kernel
    else:
        acts = x.astype(act_dtype)
        consts = (packed["w1"], packed["w2"], packed["w3"],
                  packed["vp256"], packed["vp128"])
        kernel = main_only_kernel

    if acts.shape[0] != b_pad:
        acts = jnp.pad(acts, ((0, b_pad - acts.shape[0]), (0, 0)))

    act_cols = acts.shape[1]
    act_spec = pl.BlockSpec((tm, act_cols), lambda i: (i, 0))
    out_spec = pl.BlockSpec((tm, PAD_CLASSES), lambda i: (i, 0))
    out_shape = jax.ShapeDtypeStruct((b_pad, PAD_CLASSES), out_dtype)

    # Explicit scoped-VMEM budget: double-buffered activation + output tiles,
    # resident params, plus slack.  Floor of 32 MiB covers compiler scratch
    # and v5e's 16 MiB default; cap stays under v7x's 64 MiB physical VMEM.
    wbytes = sum(int(a.size) * a.dtype.itemsize for a in consts)
    vmem_limit = (2 * tm * act_cols * jnp.dtype(act_dtype).itemsize
                  + 2 * tm * PAD_CLASSES * jnp.dtype(out_dtype).itemsize
                  + 2 * wbytes + (2 << 20))
    vmem_limit = int(min(max(vmem_limit, 32 << 20), 60 << 20))

    cparams = pltpu.CompilerParams(
        dimension_semantics=("parallel",),
        vmem_limit_bytes=vmem_limit,
    )

    out = pl.pallas_call(
        kernel,
        grid=grid,
        out_shape=out_shape,
        in_specs=[act_spec] + [_const_spec(a) for a in consts],
        out_specs=out_spec,
        compiler_params=cparams,
    )(acts, *consts)

    main_output = out[:B, 0:NUM_CLASSES]
    if not have_aux:
        return main_output, None
    aux_outputs = [out[:B, off:off + NUM_CLASSES] for off in AUX_LANE]
    return main_output, aux_outputs


# ---------------------------------------------------------------------------
# Synthetic parameters + pure-JAX reference
# ---------------------------------------------------------------------------
def init_params(key, feature_dim=FEATURE_DIM, num_classes=NUM_CLASSES):
    """PyTorch-style uniform fan-in init; Linear weights stored (in, out)."""
    keys = jax.random.split(key, 12)

    def linear(kw, kb, fan_in, fan_out):
        bound = 1.0 / math.sqrt(fan_in)
        w = jax.random.uniform(kw, (fan_in, fan_out), jnp.float32, -bound, bound)
        b = jax.random.uniform(kb, (1, fan_out), jnp.float32, -bound, bound)
        return w, b

    p = {}
    p["w1"], p["b1"] = linear(keys[0], keys[1], feature_dim, feature_dim)
    p["g1"] = jnp.ones((1, feature_dim), jnp.float32)
    p["be1"] = jnp.zeros((1, feature_dim), jnp.float32)
    p["w2"], p["b2"] = linear(keys[2], keys[3], feature_dim, feature_dim // 2)
    p["g2"] = jnp.ones((1, feature_dim // 2), jnp.float32)
    p["be2"] = jnp.zeros((1, feature_dim // 2), jnp.float32)
    p["w3"], p["b3"] = linear(keys[4], keys[5], feature_dim // 2, num_classes)
    p["w24"], p["b24"] = linear(keys[6], keys[7], feature_dim, num_classes)
    p["w77"], p["b77"] = linear(keys[8], keys[9], feature_dim, num_classes)
    p["wx"], p["bx"] = linear(keys[10], keys[11], feature_dim, num_classes)
    return p


def _reference_forward(x, params, f24, f77, fx):
    hi = jax.lax.Precision.HIGHEST

    def ln(h, g, b):
        mu = jnp.mean(h, axis=-1, keepdims=True)
        var = jnp.mean((h - mu) ** 2, axis=-1, keepdims=True)
        return (h - mu) / jnp.sqrt(var + LN_EPS) * g + b

    def lin(a, w, b):
        return jnp.dot(a, w, precision=hi) + b

    h = lin(x, params["w1"], params["b1"])
    h = jax.nn.gelu(ln(h, params["g1"], params["be1"]), approximate=False)
    h = lin(h, params["w2"], params["b2"])
    h = jax.nn.gelu(ln(h, params["g2"], params["be2"]), approximate=False)
    main = lin(h, params["w3"], params["b3"])
    aux = [lin(f24, params["w24"], params["b24"]),
           lin(f77, params["w77"], params["b77"]),
           lin(fx, params["wx"], params["bx"])]
    return main, aux


if __name__ == "__main__":
    key = jax.random.PRNGKey(0)
    kp, kx, k24, k77, kxe = jax.random.split(key, 5)

    B = 8
    params = init_params(kp)
    x = jax.random.normal(kx, (B, FEATURE_DIM), jnp.float32)
    f24 = jax.random.normal(k24, (B, FEATURE_DIM), jnp.float32)
    f77 = jax.random.normal(k77, (B, FEATURE_DIM), jnp.float32)
    fx = jax.random.normal(kxe, (B, FEATURE_DIM), jnp.float32)

    ref_main, ref_aux = _reference_forward(x, params, f24, f77, fx)

    # 1) Bit-accurate path: f32 weights + f32 activations, fused main+aux.
    packed_f32 = prepare_params(params, jnp.float32)
    main_out, aux_outs = adaptive_classifier_forward(
        x, packed_f32, f24, f77, fx, act_dtype=jnp.float32)
    jax.block_until_ready(main_out)
    jax.block_until_ready(aux_outs)
    assert main_out.shape == (B, NUM_CLASSES)
    assert jnp.allclose(main_out, ref_main, atol=5e-3, rtol=5e-3)
    for a, r in zip(aux_outs, ref_aux):
        assert a.shape == (B, NUM_CLASSES)
        assert jnp.allclose(a, r, atol=5e-3, rtol=5e-3)

    # 2) Default fast path: bf16 weights + bf16 activations, multi-tile batch
    #    (>=2 grid steps so both v7x TensorCores would be used).
    packed = prepare_params(params)             # bf16 weights by default
    B2 = 48
    x2 = jax.random.normal(jax.random.PRNGKey(1), (B2, FEATURE_DIM), jnp.float32)
    m2, a2 = adaptive_classifier_forward(x2, packed, x2, x2, x2)
    jax.block_until_ready(m2)
    rm2, ra2 = _reference_forward(x2, params, x2, x2, x2)
    assert m2.shape == (B2, NUM_CLASSES) and len(a2) == 3
    assert jnp.allclose(m2, rm2, atol=2.5e-1, rtol=2.5e-1)
    for a, r in zip(a2, ra2):
        assert jnp.allclose(a, r, atol=2.5e-1, rtol=2.5e-1)

    # 3) Main-only path (aux features absent) -> aux_outputs is None.
    m3, a3 = adaptive_classifier_forward(x, packed_f32, act_dtype=jnp.float32)
    jax.block_until_ready(m3)
    assert a3 is None and m3.shape == (B, NUM_CLASSES)
    assert jnp.allclose(m3, ref_main, atol=5e-3, rtol=5e-3)

    print("KERNEL_OK")
</pallas_src>

<mosaic_0001>
module attributes {stable_mosaic.version = 11 : i64} {
  func.func @fused_kernel(%arg0: i32, %arg1: memref<16x1024xf32, #tpu.memory_space<vmem>>, %arg2: memref<256x256xf32, #tpu.memory_space<vmem>>, %arg3: memref<256x128xf32, #tpu.memory_space<vmem>>, %arg4: memref<128x128xf32, #tpu.memory_space<vmem>>, %arg5: memref<768x128xf32, #tpu.memory_space<vmem>>, %arg6: memref<3x256xf32, #tpu.memory_space<vmem>>, %arg7: memref<4x128xf32, #tpu.memory_space<vmem>>, %arg8: memref<16x128xf32, #tpu.memory_space<vmem>>) attributes {dimension_semantics = [#tpu.dimension_semantics<parallel>], iteration_bounds = array<i64: 1>, scalar_prefetch = 0 : i64, scratch_operands = 0 : i64, tpu.core_type = #tpu.core_type<tc>, window_params = [{transform_indices = @transform_0, window_bounds = array<i64: 16, 1024>}, {pipeline_mode = #tpu.pipeline_mode<synchronous>, transform_indices = @transform_1, window_bounds = array<i64: 256, 256>}, {pipeline_mode = #tpu.pipeline_mode<synchronous>, transform_indices = @transform_2, window_bounds = array<i64: 256, 128>}, {pipeline_mode = #tpu.pipeline_mode<synchronous>, transform_indices = @transform_3, window_bounds = array<i64: 128, 128>}, {pipeline_mode = #tpu.pipeline_mode<synchronous>, transform_indices = @transform_4, window_bounds = array<i64: 768, 128>}, {pipeline_mode = #tpu.pipeline_mode<synchronous>, transform_indices = @transform_5, window_bounds = array<i64: 3, 256>}, {pipeline_mode = #tpu.pipeline_mode<synchronous>, transform_indices = @transform_6, window_bounds = array<i64: 4, 128>}, {transform_indices = @transform_7, window_bounds = array<i64: 16, 128>}]} {
    %c0 = arith.constant 0 : index
    %c0_0 = arith.constant 0 : index
    %0 = vector.load %arg6[%c0, %c0_0] : memref<3x256xf32, #tpu.memory_space<vmem>>, vector<3x256xf32>
    %c0_1 = arith.constant 0 : index
    %c0_2 = arith.constant 0 : index
    %1 = vector.load %arg7[%c0_1, %c0_2] : memref<4x128xf32, #tpu.memory_space<vmem>>, vector<4x128xf32>
    %2 = vector.extract_strided_slice %1 {offsets = [3, 0], sizes = [1, 128], strides = [1, 1]} : vector<4x128xf32> to vector<1x128xf32>
    %c0_3 = arith.constant 0 : index
    %c0_4 = arith.constant 0 : index
    %3 = vector.load %arg1[%c0_3, %c0_4] : memref<16x1024xf32, #tpu.memory_space<vmem>>, vector<16x256xf32>
    %c0_5 = arith.constant 0 : index
    %c0_6 = arith.constant 0 : index
    %4 = vector.load %arg2[%c0_5, %c0_6] : memref<256x256xf32, #tpu.memory_space<vmem>>, vector<256x256xf32>
    %c0_7 = arith.constant 0 : index
    %c0_8 = arith.constant 0 : index
    %5 = vector.load %arg3[%c0_7, %c0_8] : memref<256x128xf32, #tpu.memory_space<vmem>>, vector<256x128xf32>
    %c0_9 = arith.constant 0 : index
    %c0_10 = arith.constant 0 : index
    %6 = vector.load %arg4[%c0_9, %c0_10] : memref<128x128xf32, #tpu.memory_space<vmem>>, vector<128x128xf32>
    %7 = vector.extract_strided_slice %0 {offsets = [0, 0], sizes = [1, 256], strides = [1, 1]} : vector<3x256xf32> to vector<1x256xf32>
    %8 = vector.extract_strided_slice %0 {offsets = [1, 0], sizes = [1, 256], strides = [1, 1]} : vector<3x256xf32> to vector<1x256xf32>
    %9 = vector.extract_strided_slice %0 {offsets = [2, 0], sizes = [1, 256], strides = [1, 1]} : vector<3x256xf32> to vector<1x256xf32>
    %10 = vector.extract_strided_slice %1 {offsets = [0, 0], sizes = [1, 128], strides = [1, 1]} : vector<4x128xf32> to vector<1x128xf32>
    %11 = vector.extract_strided_slice %1 {offsets = [1, 0], sizes = [1, 128], strides = [1, 1]} : vector<4x128xf32> to vector<1x128xf32>
    %12 = vector.extract_strided_slice %1 {offsets = [2, 0], sizes = [1, 128], strides = [1, 1]} : vector<4x128xf32> to vector<1x128xf32>
    %cst = arith.constant dense<0.000000e+00> : vector<16x256xf32>
    %13 = tpu.matmul %3, %4, %cst {dimension_numbers = #tpu.dot_dimension_numbers<[1], [0], [0], [1], [0, 0, 1, 1], [], []>} : vector<16x256xf32>, vector<256x256xf32>, vector<16x256xf32> -> vector<16x256xf32>
    %14 = vector.broadcast %7 : vector<1x256xf32> to vector<16x256xf32>
    %15 = arith.addf %13, %14 : vector<16x256xf32>
    %cst_11 = arith.constant dense<0.000000e+00> : vector<16xf32>
    %16 = vector.multi_reduction <add>, %15, %cst_11 [1] : vector<16x256xf32> to vector<16xf32>
    %17 = vector.shape_cast %16 : vector<16xf32> to vector<16x1xf32>
    %cst_12 = arith.constant 2.560000e+02 : f32
    %18 = vector.broadcast %cst_12 : f32 to vector<16x1xf32>
    %19 = arith.divf %17, %18 : vector<16x1xf32>
    %20 = vector.broadcast %19 : vector<16x1xf32> to vector<16x256xf32>
    %21 = arith.subf %15, %20 : vector<16x256xf32>
    %22 = arith.mulf %21, %21 : vector<16x256xf32>
    %cst_13 = arith.constant dense<0.000000e+00> : vector<16xf32>
    %23 = vector.multi_reduction <add>, %22, %cst_13 [1] : vector<16x256xf32> to vector<16xf32>
    %24 = vector.shape_cast %23 : vector<16xf32> to vector<16x1xf32>
    %cst_14 = arith.constant 2.560000e+02 : f32
    %25 = vector.broadcast %cst_14 : f32 to vector<16x1xf32>
    %26 = arith.divf %24, %25 : vector<16x1xf32>
    %cst_15 = arith.constant 9.99999974E-6 : f32
    %27 = vector.broadcast %cst_15 : f32 to vector<16x1xf32>
    %28 = arith.addf %26, %27 : vector<16x1xf32>
    %29 = math.rsqrt %28 : vector<16x1xf32>
    %30 = vector.broadcast %29 : vector<16x1xf32> to vector<16x256xf32>
    %31 = arith.mulf %21, %30 : vector<16x256xf32>
    %32 = vector.broadcast %8 : vector<1x256xf32> to vector<16x256xf32>
    %33 = arith.mulf %31, %32 : vector<16x256xf32>
    %34 = vector.broadcast %9 : vector<1x256xf32> to vector<16x256xf32>
    %35 = arith.addf %33, %34 : vector<16x256xf32>
    %cst_16 = arith.constant 5.000000e-01 : f32
    %36 = vector.broadcast %cst_16 : f32 to vector<16x256xf32>
    %37 = arith.mulf %36, %35 : vector<16x256xf32>
    %cst_17 = arith.constant 0.707106769 : f32
    %38 = vector.broadcast %cst_17 : f32 to vector<16x256xf32>
    %39 = arith.mulf %35, %38 : vector<16x256xf32>
    %40 = math.erf %39 : vector<16x256xf32>
    %cst_18 = arith.constant 1.000000e+00 : f32
    %41 = vector.broadcast %cst_18 : f32 to vector<16x256xf32>
    %42 = arith.addf %41, %40 : vector<16x256xf32>
    %43 = arith.mulf %37, %42 : vector<16x256xf32>
    %cst_19 = arith.constant dense<0.000000e+00> : vector<16x128xf32>
    %44 = tpu.matmul %43, %5, %cst_19 {dimension_numbers = #tpu.dot_dimension_numbers<[1], [0], [0], [1], [0, 0, 1, 1], [], []>} : vector<16x256xf32>, vector<256x128xf32>, vector<16x128xf32> -> vector<16x128xf32>
    %45 = vector.broadcast %10 : vector<1x128xf32> to vector<16x128xf32>
    %46 = arith.addf %44, %45 : vector<16x128xf32>
    %cst_20 = arith.constant dense<0.000000e+00> : vector<16xf32>
    %47 = vector.multi_reduction <add>, %46, %cst_20 [1] : vector<16x128xf32> to vector<16xf32>
    %48 = vector.shape_cast %47 : vector<16xf32> to vector<16x1xf32>
    %cst_21 = arith.constant 1.280000e+02 : f32
    %49 = vector.broadcast %cst_21 : f32 to vector<16x1xf32>
    %50 = arith.divf %48, %49 : vector<16x1xf32>
    %51 = vector.broadcast %50 : vector<16x1xf32> to vector<16x128xf32>
    %52 = arith.subf %46, %51 : vector<16x128xf32>
    %53 = arith.mulf %52, %52 : vector<16x128xf32>
    %cst_22 = arith.constant dense<0.000000e+00> : vector<16xf32>
    %54 = vector.multi_reduction <add>, %53, %cst_22 [1] : vector<16x128xf32> to vector<16xf32>
    %55 = vector.shape_cast %54 : vector<16xf32> to vector<16x1xf32>
    %cst_23 = arith.constant 1.280000e+02 : f32
    %56 = vector.broadcast %cst_23 : f32 to vector<16x1xf32>
    %57 = arith.divf %55, %56 : vector<16x1xf32>
    %cst_24 = arith.constant 9.99999974E-6 : f32
    %58 = vector.broadcast %cst_24 : f32 to vector<16x1xf32>
    %59 = arith.addf %57, %58 : vector<16x1xf32>
    %60 = math.rsqrt %59 : vector<16x1xf32>
    %61 = vector.broadcast %60 : vector<16x1xf32> to vector<16x128xf32>
    %62 = arith.mulf %52, %61 : vector<16x128xf32>
    %63 = vector.broadcast %11 : vector<1x128xf32> to vector<16x128xf32>
    %64 = arith.mulf %62, %63 : vector<16x128xf32>
    %65 = vector.broadcast %12 : vector<1x128xf32> to vector<16x128xf32>
    %66 = arith.addf %64, %65 : vector<16x128xf32>
    %cst_25 = arith.constant 5.000000e-01 : f32
    %67 = vector.broadcast %cst_25 : f32 to vector<16x128xf32>
    %68 = arith.mulf %67, %66 : vector<16x128xf32>
    %cst_26 = arith.constant 0.707106769 : f32
    %69 = vector.broadcast %cst_26 : f32 to vector<16x128xf32>
    %70 = arith.mulf %66, %69 : vector<16x128xf32>
    %71 = math.erf %70 : vector<16x128xf32>
    %cst_27 = arith.constant 1.000000e+00 : f32
    %72 = vector.broadcast %cst_27 : f32 to vector<16x128xf32>
    %73 = arith.addf %72, %71 : vector<16x128xf32>
    %74 = arith.mulf %68, %73 : vector<16x128xf32>
    %cst_28 = arith.constant dense<0.000000e+00> : vector<16x128xf32>
    %75 = tpu.matmul %74, %6, %cst_28 {dimension_numbers = #tpu.dot_dimension_numbers<[1], [0], [0], [1], [0, 0, 1, 1], [], []>} : vector<16x128xf32>, vector<128x128xf32>, vector<16x128xf32> -> vector<16x128xf32>
    %c0_29 = arith.constant 0 : index
    %c256 = arith.constant 256 : index
    %76 = vector.load %arg1[%c0_29, %c256] : memref<16x1024xf32, #tpu.memory_space<vmem>>, vector<16x768xf32>
    %c0_30 = arith.constant 0 : index
    %c0_31 = arith.constant 0 : index
    %77 = vector.load %arg5[%c0_30, %c0_31] : memref<768x128xf32, #tpu.memory_space<vmem>>, vector<768x128xf32>
    %cst_32 = arith.constant dense<0.000000e+00> : vector<16x128xf32>
    %78 = tpu.matmul %76, %77, %cst_32 {dimension_numbers = #tpu.dot_dimension_numbers<[1], [0], [0], [1], [0, 0, 1, 1], [], []>} : vector<16x768xf32>, vector<768x128xf32>, vector<16x128xf32> -> vector<16x128xf32>
    %79 = arith.addf %75, %78 : vector<16x128xf32>
    %80 = vector.broadcast %2 : vector<1x128xf32> to vector<16x128xf32>
    %81 = arith.addf %79, %80 : vector<16x128xf32>
    %c0_33 = arith.constant 0 : index
    %c0_34 = arith.constant 0 : index
    %82 = vector.load %arg8[%c0_33, %c0_34] : memref<16x128xf32, #tpu.memory_space<vmem>>, vector<16x128xf32>
    tpu.vector_store %arg8[%c0_33, %c0_34], %81 {strides = array<i32>} : memref<16x128xf32, #tpu.memory_space<vmem>>, vector<16x128xf32>,
    return
  }
  func.func @transform_0(%arg0: i32) -> (i32, i32) {
    %c0_i32 = arith.constant 0 : i32
    %c0_i32_0 = arith.constant 0 : i32
    return %arg0, %c0_i32 : i32, i32
  }
  func.func @transform_1(%arg0: i32) -> (i32, i32) {
    %c0_i32 = arith.constant 0 : i32
    %c0_i32_0 = arith.constant 0 : i32
    %c0_i32_1 = arith.constant 0 : i32
    return %c0_i32, %c0_i32_0 : i32, i32
  }
  func.func @transform_2(%arg0: i32) -> (i32, i32) {
    %c0_i32 = arith.constant 0 : i32
    %c0_i32_0 = arith.constant 0 : i32
    %c0_i32_1 = arith.constant 0 : i32
    return %c0_i32, %c0_i32_0 : i32, i32
  }
  func.func @transform_3(%arg0: i32) -> (i32, i32) {
    %c0_i32 = arith.constant 0 : i32
    %c0_i32_0 = arith.constant 0 : i32
    %c0_i32_1 = arith.constant 0 : i32
    return %c0_i32, %c0_i32_0 : i32, i32
  }
  func.func @transform_4(%arg0: i32) -> (i32, i32) {
    %c0_i32 = arith.constant 0 : i32
    %c0_i32_0 = arith.constant 0 : i32
    %c0_i32_1 = arith.constant 0 : i32
    return %c0_i32, %c0_i32_0 : i32, i32
  }
  func.func @transform_5(%arg0: i32) -> (i32, i32) {
    %c0_i32 = arith.constant 0 : i32
    %c0_i32_0 = arith.constant 0 : i32
    %c0_i32_1 = arith.constant 0 : i32
    return %c0_i32, %c0_i32_0 : i32, i32
  }
  func.func @transform_6(%arg0: i32) -> (i32, i32) {
    %c0_i32 = arith.constant 0 : i32
    %c0_i32_0 = arith.constant 0 : i32
    %c0_i32_1 = arith.constant 0 : i32
    return %c0_i32, %c0_i32_0 : i32, i32
  }
  func.func @transform_7(%arg0: i32) -> (i32, i32) {
    %c0_i32 = arith.constant 0 : i32
    %c0_i32_0 = arith.constant 0 : i32
    return %arg0, %c0_i32 : i32, i32
  }
}

</mosaic_0001>

<bundles_post_ra>
// kernel: tpu_custom_call.1
= control target key start
LH: loop header
LB: loop body
LE: loop exit
PB: predicated region body
PF: predicated region fallthrough
CT: control target
= control target key end

     0   :  { %12 = vsyncpa [#allocation3], 0  ;;  %s1787_s0 = inlined_call_operand.hbm [shape: f32[16,1024], index: 0, kind: input, shape index: {}]   ;;  %s1788_s1 = inlined_call_operand.hbm [shape: f32[256,256], index: 1, kind: input, shape index: {}]   ;;  %s1789_s2 = inlined_call_operand.hbm [shape: f32[256,128], index: 2, kind: input, shape index: {}]   ;;  %s1790_s3 = inlined_call_operand.hbm [shape: f32[128,128], index: 3, kind: input, shape index: {}]   ;;  %s1791_s4 = inlined_call_operand.hbm [shape: f32[768,128], index: 4, kind: input, shape index: {}]   ;;  %s1792_s5 = inlined_call_operand.vmem [shape: f32[3,256], index: 5, kind: input, shape index: {}]   ;;  %s1793_s6 = inlined_call_operand.vmem [shape: f32[4,128], index: 6, kind: input, shape index: {}]   ;;  %s1794_s7 = inlined_call_operand.hbm [shape: f32[16,128], index: 7, kind: output, shape index: {}]  }
   0x1   :  { %13 = vsyncpa [#allocation6], 0 }
   0x2   :  { %14 = vsyncpa [#allocation9], 0 }
   0x3   :  { %15 = vsyncpa [#allocation4], 0  ;;  %s1566_s24 = smov [#allocation5]   ;;  %s1426_s28 = scalar_lea.hbm %s1788_s1, 8192 }
   0x4   :  { %s33_s25 = sshll.u32 %s1566_s24, 4  ;;  %p1427_p0 = scmp.ne.s32.totalorder %s1788_s1, %s1426_s28  ;;  %s34_s25 = int_to_ptr.vmem [resolvable:$true] %s33_s25 }
   0x5   :  { %p1430_p1 = scmp.lt.u32.totalorder %s1426_s28, %s1788_s1 }
   0x7   :  { %p1432_p2 = pnand %p1430_p1, %p1427_p0 }
   0x9   :  { %1435 = shalt.err (!%p1432_p2)
}
   0xa   :  { %s1436_s10 = scalar_lea.vmem %s34_s25, 8192  ;;  %p1441_p4 = scmp.lt.s32.totalorder %s34_s25, %s34_s25 }
   0xb   :  { %p1437_p3 = scmp.ne.s32.totalorder %s34_s25, %s1436_s10  ;;  %p1442_p5 = scmp.lt.s32.totalorder %s1436_s10, %s1436_s10 }
   0xd   :  { %p1443_p6 = por %p1442_p5, %p1441_p4 }
   0xf   :  { %p1444_p7 = pnand %p1443_p6, %p1437_p3 }
  0x11   :  { %1447 = shalt.err (!%p1444_p7)
}
  0x12   :  { %s1567_s11 = smov 256   ;;  %s1568_s12 = smov 16  }
  0x13   :  { %39 = dma.hbm_to_vmem [thread:$0]  %s1788_s1, 8192, %s34_s25, [#allocation6], %s1567_s11, %s1567_s11, %s1568_s12  }
  0x14   :  { %s1569_s15 = smov [#allocation8]   ;;  %s1570_s17 = smov [#allocation2]  }
  0x15   :  { %s57_s16 = sshll.u32 %s1569_s15, 4  ;;  %s21_s18 = sshll.u32 %s1570_s17, 4  ;;  %s58_s16 = int_to_ptr.vmem [resolvable:$true] %s57_s16  ;;  %s22_s18 = int_to_ptr.vmem [resolvable:$true] %s21_s18 }
  0x16   :  { %s1448_s21 = scalar_lea.hbm %s1790_s3, 2048 }
  0x17   :  { %p1449_p8 = scmp.ne.s32.totalorder %s1790_s3, %s1448_s21  ;;  %p1452_p9 = scmp.lt.u32.totalorder %s1448_s21, %s1790_s3 }
  0x19   :  { %p1454_p10 = pnand %p1452_p9, %p1449_p8 }
  0x1b   :  { %1457 = shalt.err (!%p1454_p10)
}
  0x1c   :  { %s1458_s1 = scalar_lea.vmem %s58_s16, 2048  ;;  %p1463_p12 = scmp.lt.s32.totalorder %s58_s16, %s58_s16 }
  0x1d   :  { %p1459_p11 = scmp.ne.s32.totalorder %s58_s16, %s1458_s1  ;;  %p1464_p13 = scmp.lt.s32.totalorder %s1458_s1, %s1458_s1 }
  0x1f   :  { %p1465_p0 = por %p1464_p13, %p1463_p12 }
  0x21   :  { %p1466_p1 = pnand %p1465_p0, %p1459_p11 }
  0x23   :  { %1469 = shalt.err (!%p1466_p1)
}
  0x24   :  { %s1571_s25 = smov 128   ;;  %s1572_s27 = smov 8  }
  0x25   :  { %63 = dma.hbm_to_vmem [thread:$0]  %s1790_s3, 2048, %s58_s16, [#allocation9], %s1571_s25, %s1571_s25, %s1572_s27  }
  0x26   :  { %s1470_s9 = scalar_lea.hbm %s1787_s0, 2048 }
  0x27   :  { %p1471_p2 = scmp.ne.s32.totalorder %s1787_s0, %s1470_s9  ;;  %p1474_p3 = scmp.lt.u32.totalorder %s1470_s9, %s1787_s0 }
  0x29   :  { %p1476_p4 = pnand %p1474_p3, %p1471_p2 }
  0x2b   :  { %1479 = shalt.err (!%p1476_p4)
}
  0x2c   :  { %s1480_s14 = scalar_lea.vmem %s22_s18, 2048  ;;  %p1485_p6 = scmp.lt.s32.totalorder %s22_s18, %s22_s18 }
  0x2d   :  { %p1481_p5 = scmp.ne.s32.totalorder %s22_s18, %s1480_s14  ;;  %p1486_p7 = scmp.lt.s32.totalorder %s1480_s14, %s1480_s14 }
  0x2f   :  { %p1487_p8 = por %p1486_p7, %p1485_p6 }
  0x31   :  { %p1488_p9 = pnand %p1487_p8, %p1481_p5 }
  0x33   :  { %1491 = shalt.err (!%p1488_p9)
}
  0x34   :  { %s1573_s3 = smov 1024   ;;  %s1574_s15 = smov 64  }
  0x35   :  { %27 = dma.hbm_to_vmem [thread:$0]  %s1787_s0, 2048, %s22_s18, [#allocation3], %s1573_s3, %s1573_s3, %s1574_s15  }
  0x36   :  { %s1575_s19 = smov [#allocation7]   ;;  %s1576_s21 = smov [#allocation10]  }
  0x37   :  { %s45_s20 = sshll.u32 %s1575_s19, 4  ;;  %s69_s22 = sshll.u32 %s1576_s21, 4  ;;  %s46_s20 = int_to_ptr.vmem [resolvable:$true] %s45_s20  ;;  %s70_s22 = int_to_ptr.vmem [resolvable:$true] %s69_s22 }
  0x38   :  { %s1492_s26 = scalar_lea.hbm %s1789_s2, 4096 }
  0x39   :  { %p1493_p10 = scmp.ne.s32.totalorder %s1789_s2, %s1492_s26  ;;  %p1496_p11 = scmp.lt.u32.totalorder %s1492_s26, %s1789_s2 }
  0x3b   :  { %p1498_p12 = pnand %p1496_p11, %p1493_p10 }
  0x3d   :  { %1501 = shalt.err (!%p1498_p12)
}
  0x3e   :  { %s1502_s0 = scalar_lea.vmem %s46_s20, 4096  ;;  %p1507_p0 = scmp.lt.s32.totalorder %s46_s20, %s46_s20 }
  0x3f   :  { %p1503_p13 = scmp.ne.s32.totalorder %s46_s20, %s1502_s0  ;;  %p1508_p1 = scmp.lt.s32.totalorder %s1502_s0, %s1502_s0 }
  0x41   :  { %p1509_p2 = por %p1508_p1, %p1507_p0 }
  0x43   :  { %p1510_p3 = pnand %p1509_p2, %p1503_p13 }
  0x45   :  { %1513 = shalt.err (!%p1510_p3)
}
  0x46   :  { %51 = dma.hbm_to_vmem [thread:$0]  %s1789_s2, 4096, %s46_s20, [#allocation6], %s1571_s25, %s1571_s25, %s1572_s27  }
  0x47   :  { %s1514_s11 = scalar_lea.hbm %s1791_s4, 12288 }
  0x48   :  { %p1515_p4 = scmp.ne.s32.totalorder %s1791_s4, %s1514_s11  ;;  %p1518_p5 = scmp.lt.u32.totalorder %s1514_s11, %s1791_s4 }
  0x4a   :  { %p1520_p6 = pnand %p1518_p5, %p1515_p4 }
  0x4c   :  { %1523 = shalt.err (!%p1520_p6)
}
  0x4d   :  { %s1524_s15 = scalar_lea.vmem %s70_s22, 12288  ;;  %p1529_p8 = scmp.lt.s32.totalorder %s70_s22, %s70_s22 }
  0x4e   :  { %p1525_p7 = scmp.ne.s32.totalorder %s70_s22, %s1524_s15  ;;  %p1530_p9 = scmp.lt.s32.totalorder %s1524_s15, %s1524_s15 }
  0x50   :  { %p1531_p10 = por %p1530_p9, %p1529_p8 }
  0x52   :  { %p1532_p11 = pnand %p1531_p10, %p1525_p7 }
  0x54   :  { %1535 = shalt.err (!%p1532_p11)
}
  0x55   :  { %75 = dma.hbm_to_vmem [thread:$0]  %s1791_s4, 12288, %s70_s22, [#allocation9], %s1571_s25, %s1571_s25, %s1572_s27  }
  0x56   :  { %1558 = dma.done.wait [#allocation3], 2048  }
  0x57   :  { %1559 = vsyncadd [#allocation3], 4294965248 }
  0x58   :  { %1560 = dma.done.wait [#allocation6], 12288  }
  0x59   :  { %1561 = vsyncadd [#allocation6], 4294955008 }
  0x5a   :  { %1562 = dma.done.wait [#allocation9], 14336  }
  0x5b   :  { %1563 = vsyncadd [#allocation9], 4294952960  ;;  %v102_v0 = vld [vmem:[#allocation5 + $0x8] sm:$0xff]  ;;  %v104_v1 = vld [vmem:[#allocation5 + $0x18] sm:$0xff] }
  0x5c   :  { %v101_v2 = vld [vmem:[#allocation5] sm:$0xff]  ;;  %v1170_v3 = vpack.c.bf16 %v104_v1, %v102_v0  ;;  %v103_v4 = vld [vmem:[#allocation5 + $0x10] sm:$0xff]  ;;  %v106_v5 = vld [vmem:[#allocation5 + $0x28] sm:$0xff] }
  0x5d   :  { %v108_v6 = vld [vmem:[#allocation5 + $0x38] sm:$0xff]  ;;  %v1172_v7 = vpack.c.bf16 %v103_v4, %v101_v2  ;;  %v105_v9 = vld [vmem:[#allocation5 + $0x20] sm:$0xff]  ;;  %v107_v10 = vld [vmem:[#allocation5 + $0x30] sm:$0xff] }
  0x5e   :  { %v1174_v8 = vpack.c.bf16 %v108_v6, %v106_v5  ;;  %v110_v11 = vld [vmem:[#allocation5 + $0x48] sm:$0xff]  ;;  %1171 = vmatprep.subr.bf16.mxu0 %v1170_v3  ;;  %v112_v12 = vld [vmem:[#allocation5 + $0x58] sm:$0xff]  ;;  %v1176_v13 = vpack.c.bf16 %v107_v10, %v105_v9  ;;  %v109_v15 = vld [vmem:[#allocation5 + $0x40] sm:$0xff] }
  0x5f   :  { %1173 = vmatpush1.bf16.msra.mxu0 %v1172_v7  ;;  %v1178_v14 = vpack.c.bf16 %v112_v12, %v110_v11  ;;  %v111_v16 = vld [vmem:[#allocation5 + $0x50] sm:$0xff]  ;;  %v114_v17 = vld [vmem:[#allocation5 + $0x68] sm:$0xff]  ;;  %v116_v18 = vld [vmem:[#allocation5 + $0x78] sm:$0xff] }
  0x60   :  { %1175 = vmatprep.subr.bf16.mxu0 %v1174_v8  ;;  %v1180_v19 = vpack.c.bf16 %v111_v16, %v109_v15  ;;  %v1182_v20 = vpack.c.bf16 %v116_v18, %v114_v17  ;;  %v113_v21 = vld [vmem:[#allocation5 + $0x60] sm:$0xff]  ;;  %v115_v22 = vld [vmem:[#allocation5 + $0x70] sm:$0xff]  ;;  %v118_v23 = vld [vmem:[#allocation5 + $0x88] sm:$0xff] }
  0x61   :  { %v120_v24 = vld [vmem:[#allocation5 + $0x98] sm:$0xff]  ;;  %v1184_v25 = vpack.c.bf16 %v115_v22, %v113_v21  ;;  %v117_v27 = vld [vmem:[#allocation5 + $0x80] sm:$0xff]  ;;  %v119_v28 = vld [vmem:[#allocation5 + $0x90] sm:$0xff] }
  0x62   :  { %v1186_v26 = vpack.c.bf16 %v120_v24, %v118_v23  ;;  %v122_v29 = vld [vmem:[#allocation5 + $0xa8] sm:$0xff]  ;;  %v124_v30 = vld [vmem:[#allocation5 + $0xb8] sm:$0xff]  ;;  %v1188_v31 = vpack.c.bf16 %v119_v28, %v117_v27  ;;  %v121_v33 = vld [vmem:[#allocation5 + $0xa0] sm:$0xff] }
  0x63   :  { %1177 = vmatpush1.bf16.msra.mxu0 %v1176_v13  ;;  %v1190_v32 = vpack.c.bf16 %v124_v30, %v122_v29  ;;  %v123_v34 = vld [vmem:[#allocation5 + $0xb0] sm:$0xff]  ;;  %v126_v35 = vld [vmem:[#allocation5 + $0xc8] sm:$0xff]  ;;  %v128_v36 = vld [vmem:[#allocation5 + $0xd8] sm:$0xff] }
  0x64   :  { %1179 = vmatprep.subr.bf16.mxu0 %v1178_v14  ;;  %v1192_v37 = vpack.c.bf16 %v123_v34, %v121_v33  ;;  %v1194_v38 = vpack.c.bf16 %v128_v36, %v126_v35  ;;  %v125_v39 = vld [vmem:[#allocation5 + $0xc0] sm:$0xff]  ;;  %v127_v40 = vld [vmem:[#allocation5 + $0xd0] sm:$0xff]  ;;  %v98_v41 = vld [vmem:[#allocation2 + $0x8] sm:$0xff]  ;;  %v214_v36 = vlaneseq }
  0x65   :  { %v130_v42 = vld [vmem:[#allocation5 + $0xe8] sm:$0xff]  ;;  %v132_v43 = vld [vmem:[#allocation5 + $0xf8] sm:$0xff]  ;;  %296 = vmatprep.mubr.f32.mxu0 %v98_v41  ;;  %v1196_v44 = vpack.c.bf16 %v127_v40, %v125_v39  ;;  %v129_v46 = vld [vmem:[#allocation5 + $0xe0] sm:$0xff] }
  0x66   :  { %v1198_v45 = vpack.c.bf16 %v132_v43, %v130_v42  ;;  %v131_v47 = vld [vmem:[#allocation5 + $0xf0] sm:$0xff]  ;;  %v134_v48 = vld [vmem:[#allocation5 + $0x108] sm:$0xff]  ;;  %v136_v49 = vld [vmem:[#allocation5 + $0x118] sm:$0xff] }
  0x67   :  { %1181 = vmatpush1.bf16.msra.mxu0 %v1180_v19  ;;  %v1200_v50 = vpack.c.bf16 %v131_v47, %v129_v46  ;;  %v1202_v51 = vpack.c.bf16 %v136_v49, %v134_v48  ;;  %v133_v52 = vld [vmem:[#allocation5 + $0x100] sm:$0xff]  ;;  %v135_v53 = vld [vmem:[#allocation5 + $0x110] sm:$0xff]  ;;  %v138_v54 = vld [vmem:[#allocation5 + $0x128] sm:$0xff] }
  0x68   :  { %1183 = vmatprep.subr.bf16.mxu0 %v1182_v20  ;;  %v140_v55 = vld [vmem:[#allocation5 + $0x138] sm:$0xff]  ;;  %v1204_v56 = vpack.c.bf16 %v135_v53, %v133_v52  ;;  %v137_v58 = vld [vmem:[#allocation5 + $0x120] sm:$0xff]  ;;  %v139_v59 = vld [vmem:[#allocation5 + $0x130] sm:$0xff] }
  0x69   :  { %v1206_v57 = vpack.c.bf16 %v140_v55, %v138_v54  ;;  %v142_v60 = vld [vmem:[#allocation5 + $0x148] sm:$0xff]  ;;  %v144_v61 = vld [vmem:[#allocation5 + $0x158] sm:$0xff]  ;;  %v1208_v62 = vpack.c.bf16 %v139_v59, %v137_v58  ;;  %v141_v0 = vld [vmem:[#allocation5 + $0x140] sm:$0xff] }
  0x6a   :  { %v1210_v63 = vpack.c.bf16 %v144_v61, %v142_v60  ;;  %v143_v1 = vld [vmem:[#allocation5 + $0x150] sm:$0xff]  ;;  %v146_v2 = vld [vmem:[#allocation5 + $0x168] sm:$0xff]  ;;  %v148_v3 = vld [vmem:[#allocation5 + $0x178] sm:$0xff] }
  0x6b   :  { %1185 = vmatpush1.bf16.msra.mxu0 %v1184_v25  ;;  %v1212_v4 = vpack.c.bf16 %v143_v1, %v141_v0  ;;  %v1214_v5 = vpack.c.bf16 %v148_v3, %v146_v2  ;;  %v145_v6 = vld [vmem:[#allocation5 + $0x160] sm:$0xff]  ;;  %v147_v7 = vld [vmem:[#allocation5 + $0x170] sm:$0xff]  ;;  %v150_v8 = vld [vmem:[#allocation5 + $0x188] sm:$0xff] }
  0x6c   :  { %1187 = vmatprep.subr.bf16.mxu0 %v1186_v26  ;;  %v152_v9 = vld [vmem:[#allocation5 + $0x198] sm:$0xff]  ;;  %v1216_v10 = vpack.c.bf16 %v147_v7, %v145_v6  ;;  %v149_v12 = vld [vmem:[#allocation5 + $0x180] sm:$0xff]  ;;  %v151_v13 = vld [vmem:[#allocation5 + $0x190] sm:$0xff] }
  0x6d   :  { %v1218_v11 = vpack.c.bf16 %v152_v9, %v150_v8  ;;  %v154_v14 = vld [vmem:[#allocation5 + $0x1a8] sm:$0xff]  ;;  %v156_v15 = vld [vmem:[#allocation5 + $0x1b8] sm:$0xff]  ;;  %v1220_v16 = vpack.c.bf16 %v151_v13, %v149_v12  ;;  %v153_v18 = vld [vmem:[#allocation5 + $0x1a0] sm:$0xff] }
  0x6e   :  { %v1222_v17 = vpack.c.bf16 %v156_v15, %v154_v14  ;;  %v155_v19 = vld [vmem:[#allocation5 + $0x1b0] sm:$0xff]  ;;  %v158_v20 = vld [vmem:[#allocation5 + $0x1c8] sm:$0xff]  ;;  %v160_v21 = vld [vmem:[#allocation5 + $0x1d8] sm:$0xff] }
  0x6f   :  { %1189 = vmatpush1.bf16.msra.mxu0 %v1188_v31  ;;  %v1224_v22 = vpack.c.bf16 %v155_v19, %v153_v18  ;;  %v1226_v23 = vpack.c.bf16 %v160_v21, %v158_v20  ;;  %v157_v24 = vld [vmem:[#allocation5 + $0x1c0] sm:$0xff]  ;;  %v159_v25 = vld [vmem:[#allocation5 + $0x1d0] sm:$0xff]  ;;  %v162_v26 = vld [vmem:[#allocation5 + $0x1e8] sm:$0xff] }
  0x70   :  { %1191 = vmatprep.subr.bf16.mxu0 %v1190_v32  ;;  %v164_v27 = vld [vmem:[#allocation5 + $0x1f8] sm:$0xff]  ;;  %v1228_v28 = vpack.c.bf16 %v159_v25, %v157_v24  ;;  %v161_v30 = vld [vmem:[#allocation5 + $0x1e0] sm:$0xff]  ;;  %v163_v31 = vld [vmem:[#allocation5 + $0x1f0] sm:$0xff] }
  0x71   :  { %v1230_v29 = vpack.c.bf16 %v164_v27, %v162_v26  ;;  %v1232_v32 = vpack.c.bf16 %v163_v31, %v161_v30  ;;  %v97_v33 = vld [vmem:[#allocation2] sm:$0xff]  ;;  %v100_v34 = vld [vmem:[#allocation2 + $0x48] sm:$0xff]  ;;  %v184_v12 = vld [vmem:[#allocation7 + $0x98] sm:$0xff] }
  0x72   :  { %v99_v35 = vld [vmem:[#allocation2 + $0x40] sm:$0xff]  ;;  %v182_v6 = vld [vmem:[#allocation7 + $0x88] sm:$0xff]  ;;  %v167_v13 = vld [vmem:[#allocation7 + $0x10] sm:$0xff] }
  0x73   :  { %1193 = vmatpush1.bf16.msra.mxu0 %v1192_v37  ;;  %v1687_v37 = vshrl.u32 %v214_v36, 7  ;;  %v1695_v39 = vld [vmem:[%s1792_s5] sm:$0x77]  ;;  %v166_v9 = vld [vmem:[#allocation7 + $0x8] sm:$0xff]  ;;  %v168_v15 = vld [vmem:[#allocation7 + $0x18] sm:$0xff] }
  0x74   :  { %1195 = vmatprep.subr.bf16.mxu0 %v1194_v38  ;;  %v165_v8 = vld [vmem:[#allocation7] sm:$0xff]  ;;  %v1240_v18 = vpack.c.bf16 %v168_v15, %v167_v13  ;;  %v170_v21 = vld [vmem:[#allocation7 + $0x28] sm:$0xff]  ;;  %v171_v26 = vld [vmem:[#allocation7 + $0x30] sm:$0xff] }
  0x75   :  { %v1690_v38 = vsub.s32 0, %v1687_v37  ;;  %v220_v40 = vsub.s32 4, %v1687_v37  ;;  %v169_v20 = vld [vmem:[#allocation7 + $0x20] sm:$0xff]  ;;  %v172_v27 = vld [vmem:[#allocation7 + $0x38] sm:$0xff] }
  0x76   :  { %v1244_v24 = vpack.c.bf16 %v170_v21, %v169_v20  ;;  %v1248_v30 = vpack.c.bf16 %v172_v27, %v171_v26 }
  0x77   :  { %1197 = vmatpush1.bf16.msra.mxu0 %v1196_v44  ;;  %v217_v41 = vrot.slane %v1695_v39, %v1690_v38  ;;  %v221_v42 = vrot.slane %v1695_v39, %v220_v40 }
  0x78   :  { %1199 = vmatprep.subr.bf16.mxu0 %v1198_v45 }
  0x79   :  { %v227_v43 = vrot.slane %v217_v41, %v1690_v38  ;;  %v231_v44 = vrot.slane %v221_v42, %v1690_v38  ;;  %v175_v41 = vld [vmem:[#allocation7 + $0x50] sm:$0xff]  ;;  %v176_v42 = vld [vmem:[#allocation7 + $0x58] sm:$0xff] }
  0x7b   :  { %1201 = vmatpush1.bf16.msra.mxu0 %v1200_v50 }
  0x7c   :  { %1203 = vmatprep.subr.bf16.mxu0 %v1202_v51 }
  0x7f   :  { %1205 = vmatpush1.bf16.msra.mxu0 %v1204_v56 }
  0x80   :  { %1207 = vmatprep.subr.bf16.mxu0 %v1206_v57 }
  0x83   :  { %1209 = vmatpush1.bf16.msra.mxu0 %v1208_v62 }
  0x84   :  { %1211 = vmatprep.subr.bf16.mxu0 %v1210_v63 }
  0x87   :  { %1213 = vmatpush1.bf16.msra.mxu0 %v1212_v4 }
  0x88   :  { %1215 = vmatprep.subr.bf16.mxu0 %v1214_v5  ;;  %v181_v5 = vld [vmem:[#allocation7 + $0x80] sm:$0xff] }
  0x89   :  { %v1234_v7 = vpack.c.bf16 %v182_v6, %v181_v5  ;;  %v370_v5 = vsub.s32 6, %v1687_v37 }
  0x8b   :  { %1217 = vmatpush1.bf16.msra.mxu0 %v1216_v10  ;;  %v1236_v10 = vpack.c.bf16 %v166_v9, %v165_v8  ;;  %1235 = vmatprep.subr.bf16.mxu1 %v1234_v7  ;;  %v371_v8 = vrot.slane %v1695_v39, %v370_v5 }
  0x8c   :  { %1219 = vmatprep.subr.bf16.mxu0 %v1218_v11  ;;  %v183_v11 = vld [vmem:[#allocation7 + $0x90] sm:$0xff] }
  0x8d   :  { %1237 = vmatpush3.bf16.msra.mxu1 %v1236_v10  ;;  %v1238_v14 = vpack.c.bf16 %v184_v12, %v183_v11 }
  0x8f   :  { %1221 = vmatpush1.bf16.msra.mxu0 %v1220_v16  ;;  %v185_v16 = vld [vmem:[#allocation7 + $0xa0] sm:$0xff]  ;;  %1239 = vmatprep.subr.bf16.mxu1 %v1238_v14 }
  0x90   :  { %1223 = vmatprep.subr.bf16.mxu0 %v1222_v17  ;;  %v186_v17 = vld [vmem:[#allocation7 + $0xa8] sm:$0xff] }
  0x91   :  { %v1242_v19 = vpack.c.bf16 %v186_v17, %v185_v16  ;;  %1241 = vmatpush3.bf16.msra.mxu1 %v1240_v18 }
  0x93   :  { %1225 = vmatpush1.bf16.msra.mxu0 %v1224_v22  ;;  %v187_v22 = vld [vmem:[#allocation7 + $0xb0] sm:$0xff]  ;;  %1243 = vmatprep.subr.bf16.mxu1 %v1242_v19 }
  0x94   :  { %1227 = vmatprep.subr.bf16.mxu0 %v1226_v23  ;;  %v188_v23 = vld [vmem:[#allocation7 + $0xb8] sm:$0xff] }
  0x95   :  { %v1246_v25 = vpack.c.bf16 %v188_v23, %v187_v22  ;;  %1245 = vmatpush3.bf16.msra.mxu1 %v1244_v24 }
  0x97   :  { %1229 = vmatpush1.bf16.msra.mxu0 %v1228_v28  ;;  %v189_v28 = vld [vmem:[#allocation7 + $0xc0] sm:$0xff]  ;;  %1247 = vmatprep.subr.bf16.mxu1 %v1246_v25 }
  0x98   :  { %1231 = vmatprep.subr.bf16.mxu0 %v1230_v29  ;;  %v190_v29 = vld [vmem:[#allocation7 + $0xc8] sm:$0xff] }
  0x99   :  { %v1250_v31 = vpack.c.bf16 %v190_v29, %v189_v28  ;;  %1249 = vmatpush3.bf16.msra.mxu1 %v1248_v30 }
  0x9b   :  { %1233 = vmatpush1.bf16.msra.mxu0 %v1232_v32  ;;  %v173_v32 = vld [vmem:[#allocation7 + $0x40] sm:$0xff]  ;;  %1251 = vmatprep.subr.bf16.mxu1 %v1250_v31 }
  0x9e   :  { %297 = vmatmul.mubr.f32.vlgmr.msra.gmra.mrb[0].mxu0 %v97_v33  ;;  %v174_v33 = vld [vmem:[#allocation7 + $0x48] sm:$0xff] }
  0x9f   :  { %302 = vmatprep.mubr.f32.mxu0 %v100_v34  ;;  %v191_v34 = vld [vmem:[#allocation7 + $0xd0] sm:$0xff]  ;;  %v1252_v36 = vpack.c.bf16 %v174_v33, %v173_v32 }
  0xa1   :  { %1253 = vmatpush3.bf16.msra.mxu1 %v1252_v36 }
  0xa2   :  { %303 = vmatmul.mubr.f32.gmra.mrb[2].mxu0 %v99_v35  ;;  %v192_v35 = vld [vmem:[#allocation7 + $0xd8] sm:$0xff] }
  0xa3   :  { %v1254_v40 = vpack.c.bf16 %v192_v35, %v191_v34 }
  0xa5   :  { %1255 = vmatprep.subr.bf16.mxu1 %v1254_v40 }
 0x171   :  { %v298_v45 = vpop.f32.mrb[0].mxu0 }
 0x172   :  { %v299_v46 = vadd.f32 %v298_v45, %v227_v43  ;;  %v300_v47 = vpop.f32.mrb[1].mxu0  ;;  %v1256_v45 = vpack.c.bf16 %v176_v42, %v175_v41 }
 0x173   :  { %v301_v48 = vadd.f32 %v300_v47, %v231_v44  ;;  %v177_v47 = vld [vmem:[#allocation7 + $0x60] sm:$0xff] }
 0x174   :  { %1257 = vmatpush3.bf16.msra.mxu1 %v1256_v45 }
 0x175   :  { %v304_v49 = vpop.f32.mrb[2].mxu0  ;;  %v309_v50 = vadd.f32 %v301_v48, %v299_v46 }
 0x176   :  { %v305_v51 = vadd.f32 %v304_v49, %v227_v43  ;;  %v306_v52 = vpop.f32.mrb[3].mxu0  ;;  %v193_v43 = vld [vmem:[#allocation7 + $0xe0] sm:$0xff]  ;;  %v195_v49 = vld [vmem:[#allocation7 + $0xf0] sm:$0xff] }
 0x177   :  { %v307_v53 = vadd.f32 %v306_v52, %v231_v44  ;;  %310 = vadd.xlane.f32.xlu0 %v309_v50  ;;  %v194_v44 = vld [vmem:[#allocation7 + $0xe8] sm:$0xff]  ;;  %v196_v50 = vld [vmem:[#allocation7 + $0xf8] sm:$0xff] }
 0x178   :  { %v1262_v52 = vpack.c.bf16 %v196_v50, %v195_v49 }
 0x179   :  { %v312_v54 = vadd.f32 %v307_v53, %v305_v51 }
 0x17b   :  { %313 = vadd.xlane.f32.xlu0 %v312_v54  ;;  %v180_v54 = vld [vmem:[#allocation7 + $0x78] sm:$0xff] }
 0x204   :  { %v311_v55 = vpop.xlane.xlu0 %310 }
 0x205   :  { %v316_v56 = vmul.f32 0.00390625, %v311_v55 }
 0x207   :  { %v1703_v57 = vsub.f32 %v299_v46, %v316_v56  ;;  %v1705_v58 = vsub.f32 %v301_v48, %v316_v56  ;;  %v1258_v46 = vpack.c.bf16 %v194_v44, %v193_v43  ;;  %v178_v48 = vld [vmem:[#allocation7 + $0x68] sm:$0xff] }
 0x208   :  { %v314_v59 = vpop.xlane.xlu0 %313 }
 0x209   :  { %v317_v60 = vmul.f32 0.00390625, %v314_v59  ;;  %v322_v61 = vmul.f32 %v1703_v57, %v1703_v57  ;;  %v323_v62 = vmul.f32 %v1705_v58, %v1705_v58  ;;  %1259 = vmatprep.subr.bf16.mxu1 %v1258_v46  ;;  %v1744_v46 = vld [vmem:[%s1793_s6] sm:$0xf]  ;;  %s1577_s6 = smov [#allocation11]  }
 0x20a   :  { %s951_s20 = sshll.u32 %s1577_s6, 4  ;;  %s952_s20 = int_to_ptr.vmem [resolvable:$true] %s951_s20 }
 0x20b   :  { %v1711_v63 = vsub.f32 %v305_v51, %v317_v60  ;;  %v1713_v0 = vsub.f32 %v307_v53, %v317_v60  ;;  %v326_v1 = vadd.f32 %v323_v62, %v322_v61  ;;  %v1260_v51 = vpack.c.bf16 %v178_v48, %v177_v47  ;;  %v179_v53 = vld [vmem:[#allocation7 + $0x70] sm:$0xff]  ;;  %s1536_s21 = scalar_lea.vmem %s952_s20, 256  ;;  %p1541_p13 = scmp.lt.s32.totalorder %s952_s20, %s952_s20 }
 0x20c   :  { %v1264_v55 = vpack.c.bf16 %v180_v54, %v179_v53  ;;  %v409_v48 = vrot.slane %v1744_v46, %v1690_v38  ;;  %v561_v38 = vld [vmem:[#allocation10 + $0x98] sm:$0xff]  ;;  %p1537_p12 = scmp.ne.s32.totalorder %s952_s20, %s1536_s21  ;;  %p1542_p0 = scmp.lt.s32.totalorder %s1536_s21, %s1536_s21 }
 0x20d   :  { %327 = vadd.xlane.f32.xlu1 %v326_v1  ;;  %v324_v2 = vmul.f32 %v1711_v63, %v1711_v63  ;;  %v325_v3 = vmul.f32 %v1713_v0, %v1713_v0  ;;  %1261 = vmatpush3.bf16.msra.mxu1 %v1260_v51  ;;  %v1720_v1 = vsub.s32 1, %v1687_v37 }
 0x20e   :  { %1263 = vmatprep.subr.bf16.mxu1 %v1262_v52  ;;  %p1543_p1 = por %p1542_p0, %p1541_p13 }
 0x20f   :  { %v329_v4 = vadd.f32 %v325_v3, %v324_v2  ;;  %v348_v2 = vsub.s32 5, %v1687_v37  ;;  %v345_v7 = vrot.slane %v1695_v39, %v1720_v1 }
 0x210   :  { %p1544_p2 = pnand %p1543_p1, %p1537_p12 }
 0x211   :  { %330 = vadd.xlane.f32.xlu1 %v329_v4  ;;  %1265 = vmatpush3.bf16.msra.mxu1 %v1264_v55  ;;  %v1724_v4 = vsub.s32 2, %v1687_v37  ;;  %v349_v6 = vrot.slane %v1695_v39, %v348_v2  ;;  %v355_v11 = vrot.slane %v345_v7, %v1720_v1  ;;  %v560_v2 = vld [vmem:[#allocation10 + $0x90] sm:$0xff]  ;;  %v545_v7 = vld [vmem:[#allocation10 + $0x18] sm:$0xff] }
 0x212   :  { %v1270_v5 = vpack.c.bf16 %v561_v38, %v560_v2  ;;  %v554_v2 = vld [vmem:[#allocation10 + $0x60] sm:$0xff]  ;;  %v555_v38 = vld [vmem:[#allocation10 + $0x68] sm:$0xff] }
 0x213   :  { %v367_v9 = vrot.slane %v1695_v39, %v1724_v4  ;;  %v359_v10 = vrot.slane %v349_v6, %v1720_v1  ;;  %v381_v14 = vrot.slane %v371_v8, %v1724_v4  ;;  %v544_v6 = vld [vmem:[#allocation10 + $0x10] sm:$0xff]  ;;  %v562_v8 = vld [vmem:[#allocation10 + $0xa0] sm:$0xff] }
 0x215   :  { %v377_v16 = vrot.slane %v367_v9, %v1724_v4  ;;  %v563_v9 = vld [vmem:[#allocation10 + $0xa8] sm:$0xff] }
 0x29a   :  { %v328_v56 = vpop.xlane.xlu1 %327 }
 0x29b   :  { %v332_v59 = vmul.f32 0.00390625, %v328_v56  ;;  %v558_v56 = vld [vmem:[#allocation10 + $0x80] sm:$0xff] }
 0x29d   :  { %v334_v60 = vadd.f32 1e-05, %v332_v59  ;;  %v559_v59 = vld [vmem:[#allocation10 + $0x88] sm:$0xff] }
 0x29e   :  { %v331_v61 = vpop.xlane.xlu1 %330 }
 0x29f   :  { %1406 = vrsqrt.f32 %v334_v60  ;;  %v333_v62 = vmul.f32 0.00390625, %v331_v61  ;;  %v542_v60 = vld [vmem:[#allocation10] sm:$0xff]  ;;  %v1266_v61 = vpack.c.bf16 %v559_v59, %v558_v56 }
 0x2a1   :  { %v335_v3 = vadd.f32 1e-05, %v333_v62  ;;  %v543_v62 = vld [vmem:[#allocation10 + $0x8] sm:$0xff]  ;;  %1267 = vmatprep.subr.bf16.mxu1 %v1266_v61  ;;  %v581_v61 = vld [vmem:[#allocation10 + $0x138] sm:$0xff] }
 0x2a3   :  { %1408 = vrsqrt.f32 %v335_v3  ;;  %v1268_v3 = vpack.c.bf16 %v543_v62, %v542_v60  ;;  %v580_v60 = vld [vmem:[#allocation10 + $0x130] sm:$0xff] }
 0x2a9   :  { %v1407_v12 = vpop.eup %1406 }
 0x2aa   :  { %v339_v13 = vmul.f32 %v1407_v12, %v1705_v58  ;;  %v338_v15 = vmul.f32 %v1407_v12, %v1703_v57  ;;  %v546_v12 = vld [vmem:[#allocation10 + $0x20] sm:$0xff] }
 0x2ac   :  { %v361_v17 = vmul.f32 %v359_v10, %v339_v13  ;;  %v360_v18 = vmul.f32 %v355_v11, %v338_v15  ;;  %v547_v13 = vld [vmem:[#allocation10 + $0x28] sm:$0xff]  ;;  %v565_v15 = vld [vmem:[#allocation10 + $0xb8] sm:$0xff] }
 0x2ad   :  { %v1409_v19 = vpop.eup %1408 }
 0x2ae   :  { %v383_v20 = vadd.f32 %v381_v14, %v361_v17  ;;  %v382_v21 = vadd.f32 %v377_v16, %v360_v18  ;;  %v341_v39 = vmul.f32 %v1409_v19, %v1713_v0  ;;  %v340_v22 = vmul.f32 %v1409_v19, %v1711_v63  ;;  %v548_v18 = vld [vmem:[#allocation10 + $0x30] sm:$0xff]  ;;  %v549_v19 = vld [vmem:[#allocation10 + $0x38] sm:$0xff] }
 0x2b0   :  { %v391_v23 = vmul.f32 0.70710677, %v383_v20  ;;  %v390_v24 = vmul.f32 0.70710677, %v382_v21  ;;  %v363_v25 = vmul.f32 %v359_v10, %v341_v39  ;;  %v362_v26 = vmul.f32 %v355_v11, %v340_v22  ;;  %v590_v39 = vld [vmem:[#allocation10 + $0x180] sm:$0xff]  ;;  %v591_v22 = vld [vmem:[#allocation10 + $0x188] sm:$0xff] }
 0x2b1   :  { %v387_v31 = vmul.f32 0.5, %v383_v20  ;;  %v386_v33 = vmul.f32 0.5, %v382_v21  ;;  %v1272_v10 = vpack.c.bf16 %v545_v7, %v544_v6  ;;  %v1274_v11 = vpack.c.bf16 %v563_v9, %v562_v8  ;;  %v566_v20 = vld [vmem:[#allocation10 + $0xc0] sm:$0xff]  ;;  %v567_v21 = vld [vmem:[#allocation10 + $0xc8] sm:$0xff] }
 0x2b2   :  { %1410 = verf.f32 %v391_v23  ;;  %v385_v58 = vadd.f32 %v381_v14, %v363_v25  ;;  %v384_v27 = vadd.f32 %v377_v16, %v362_v26  ;;  %v564_v14 = vld [vmem:[#allocation10 + $0xb0] sm:$0xff]  ;;  %v1276_v16 = vpack.c.bf16 %v547_v13, %v546_v12  ;;  %v574_v23 = vld [vmem:[#allocation10 + $0x100] sm:$0xff]  ;;  %v599_v7 = vld [vmem:[#allocation10 + $0x1c8] sm:$0xff] }
 0x2b3   :  { %1412 = verf.f32 %v390_v24  ;;  %v1278_v17 = vpack.c.bf16 %v565_v15, %v564_v14  ;;  %v575_v24 = vld [vmem:[#allocation10 + $0x108] sm:$0xff]  ;;  %v1280_v25 = vpack.c.bf16 %v549_v19, %v548_v18  ;;  %v550_v26 = vld [vmem:[#allocation10 + $0x40] sm:$0xff]  ;;  %v1312_v8 = vpack.c.bf16 %v581_v61, %v580_v60  ;;  %v557_v15 = vld [vmem:[#allocation10 + $0x78] sm:$0xff] }
 0x2b4   :  { %v393_v57 = vmul.f32 0.70710677, %v385_v58  ;;  %v392_v28 = vmul.f32 0.70710677, %v384_v27  ;;  %v389_v40 = vmul.f32 0.5, %v385_v58  ;;  %v388_v42 = vmul.f32 0.5, %v384_v27 }
 0x2b5   :  { %v1298_v58 = vpack.c.bf16 %v591_v22, %v590_v39  ;;  %v1300_v27 = vpack.c.bf16 %v575_v24, %v574_v23  ;;  %v598_v6 = vld [vmem:[#allocation10 + $0x1c0] sm:$0xff]  ;;  %v1292_v9 = vpack.c.bf16 %v555_v38, %v554_v2  ;;  %v583_v13 = vld [vmem:[#allocation10 + $0x148] sm:$0xff]  ;;  %v584_v23 = vld [vmem:[#allocation10 + $0x150] sm:$0xff] }
 0x2b6   :  { %1414 = verf.f32 %v393_v57  ;;  %v531_v57 = vld [vmem:[#allocation2 + $0x18] sm:$0xff]  ;;  %v582_v12 = vld [vmem:[#allocation10 + $0x140] sm:$0xff]  ;;  %v623_v19 = vld [vmem:[#allocation10 + $0x288] sm:$0xff] }
 0x2b7   :  { %1416 = verf.f32 %v392_v28  ;;  %v1282_v28 = vpack.c.bf16 %v567_v21, %v566_v20  ;;  %1299 = vmatprep.subr.bf16.mxu0 %v1298_v58  ;;  %v622_v18 = vld [vmem:[#allocation10 + $0x280] sm:$0xff]  ;;  %v1316_v20 = vpack.c.bf16 %v583_v13, %v582_v12  ;;  %v585_v24 = vld [vmem:[#allocation10 + $0x158] sm:$0xff]  ;;  %v616_v13 = vld [vmem:[#allocation10 + $0x250] sm:$0xff] }
 0x2b8   :  { %1301 = vmatpush3.bf16.msra.mxu0 %v1300_v27  ;;  %v606_v39 = vld [vmem:[#allocation10 + $0x200] sm:$0xff]  ;;  %v603_v27 = vld [vmem:[#allocation10 + $0x1e8] sm:$0xff]  ;;  %v613_v2 = vld [vmem:[#allocation10 + $0x238] sm:$0xff] }
 0x2b9   :  { %v602_v58 = vld [vmem:[#allocation10 + $0x1e0] sm:$0xff] }
 0x2ba   :  { %v630_v38 = vld [vmem:[#allocation10 + $0x2c0] sm:$0xff] }
 0x2bc   :  { %v1411_v29 = vpop.eup %1410 }
 0x2bd   :  { %v1413_v30 = vpop.eup %1412  ;;  %v399_v32 = vadd.f32 1.0, %v1411_v29  ;;  %v551_v29 = vld [vmem:[#allocation10 + $0x48] sm:$0xff] }
 0x2be   :  { %v398_v0 = vadd.f32 1.0, %v1413_v30  ;;  %v568_v30 = vld [vmem:[#allocation10 + $0xd0] sm:$0xff] }
 0x2bf   :  { %v403_v34 = vmul.f32 %v399_v32, %v387_v31  ;;  %v569_v31 = vld [vmem:[#allocation10 + $0xd8] sm:$0xff]  ;;  %v592_v32 = vld [vmem:[#allocation10 + $0x190] sm:$0xff] }
 0x2c0   :  { %v402_v63 = vmul.f32 %v398_v0, %v386_v33  ;;  %v1415_v35 = vpop.eup %1414  ;;  %v593_v33 = vld [vmem:[#allocation10 + $0x198] sm:$0xff]  ;;  %v576_v0 = vld [vmem:[#allocation10 + $0x110] sm:$0xff] }
 0x2c1   :  { %474 = vmatprep.mubr.f32.mxu1 %v403_v34  ;;  %v1417_v36 = vpop.eup %1416  ;;  %v401_v41 = vadd.f32 1.0, %v1415_v35  ;;  %v1302_v34 = vpack.c.bf16 %v593_v33, %v592_v32  ;;  %v1284_v35 = vpack.c.bf16 %v551_v29, %v550_v26  ;;  %v607_v26 = vld [vmem:[#allocation10 + $0x208] sm:$0xff]  ;;  %v530_v29 = vld [vmem:[#allocation2 + $0x10] sm:$0xff]  ;;  %v1322_v33 = vpack.c.bf16 %v603_v27, %v602_v58 }
 0x2c2   :  { %475 = vmatmul.mubr.f32.vlgmr.msra.gmra.mrb[0].mxu1 %v402_v63  ;;  %v400_v43 = vadd.f32 1.0, %v1417_v36  ;;  %v577_v63 = vld [vmem:[#allocation10 + $0x118] sm:$0xff]  ;;  %v552_v36 = vld [vmem:[#allocation10 + $0x50] sm:$0xff] }
 0x2c3   :  { %v405_v44 = vmul.f32 %v401_v41, %v389_v40  ;;  %1269 = vmatpush3.bf16.msra.mxu1 %v1268_v3  ;;  %v553_v40 = vld [vmem:[#allocation10 + $0x58] sm:$0xff]  ;;  %v1304_v41 = vpack.c.bf16 %v577_v63, %v576_v0  ;;  %1303 = vmatprep.subr.bf16.mxu0 %v1302_v34  ;;  %v572_v3 = vld [vmem:[#allocation10 + $0xf0] sm:$0xff]  ;;  %v586_v0 = vld [vmem:[#allocation10 + $0x160] sm:$0xff] }
 0x2c4   :  { %v404_v45 = vmul.f32 %v400_v43, %v388_v42  ;;  %1271 = vmatprep.subr.bf16.mxu1 %v1270_v5  ;;  %v594_v42 = vld [vmem:[#allocation10 + $0x1a0] sm:$0xff]  ;;  %v1286_v43 = vpack.c.bf16 %v569_v31, %v568_v30  ;;  %v1288_v56 = vpack.c.bf16 %v553_v40, %v552_v36  ;;  %v573_v5 = vld [vmem:[#allocation10 + $0xf8] sm:$0xff]  ;;  %v1320_v30 = vpack.c.bf16 %v585_v24, %v584_v23  ;;  %v608_v32 = vld [vmem:[#allocation10 + $0x210] sm:$0xff] }
 0x2c5   :  { %479 = vmatprep.mubr.f32.mxu1 %v405_v44  ;;  %v595_v44 = vld [vmem:[#allocation10 + $0x1a8] sm:$0xff]  ;;  %1305 = vmatpush3.bf16.msra.mxu0 %v1304_v41  ;;  %v1294_v14 = vpack.c.bf16 %v573_v5, %v572_v3  ;;  %v1332_v31 = vpack.c.bf16 %v607_v26, %v606_v39  ;;  %v604_v36 = vld [vmem:[#allocation10 + $0x1f0] sm:$0xff]  ;;  %v605_v40 = vld [vmem:[#allocation10 + $0x1f8] sm:$0xff] }
 0x2c6   :  { %480 = vmatmul.mubr.f32.gmra.mrb[2].mxu1 %v404_v45  ;;  %v578_v45 = vld [vmem:[#allocation10 + $0x120] sm:$0xff]  ;;  %v587_v34 = vld [vmem:[#allocation10 + $0x168] sm:$0xff] }
 0x2c7   :  { %1273 = vmatpush3.bf16.msra.mxu1 %v1272_v10  ;;  %702 = vmatprep.mubr.f32.mxu1 %v531_v57  ;;  %v556_v10 = vld [vmem:[#allocation10 + $0x70] sm:$0xff]  ;;  %v626_v41 = vld [vmem:[#allocation10 + $0x2a0] sm:$0xff]  ;;  %v631_v3 = vld [vmem:[#allocation10 + $0x2c8] sm:$0xff] }
 0x2c8   :  { %1275 = vmatprep.subr.bf16.mxu1 %v1274_v11  ;;  %v1314_v11 = vpack.c.bf16 %v599_v7, %v598_v6  ;;  %v1296_v21 = vpack.c.bf16 %v557_v15, %v556_v10  ;;  %v624_v57 = vld [vmem:[#allocation10 + $0x290] sm:$0xff]  ;;  %v1346_v6 = vpack.c.bf16 %v631_v3, %v630_v38  ;;  %v614_v7 = vld [vmem:[#allocation10 + $0x240] sm:$0xff]  ;;  %v633_v10 = vld [vmem:[#allocation10 + $0x2d8] sm:$0xff] }
 0x2c9   :  { %v634_v15 = vld [vmem:[#allocation10 + $0x2e0] sm:$0xff]  ;;  %v210_v3 = vld [vmem:[#allocation8 + $0x68] sm:$0xff] }
 0x2ca   :  { %v209_v38 = vld [vmem:[#allocation8 + $0x60] sm:$0xff] }
 0x2cb   :  { %1277 = vmatpush3.bf16.msra.mxu1 %v1276_v16  ;;  %v600_v16 = vld [vmem:[#allocation10 + $0x1d0] sm:$0xff] }
 0x2cc   :  { %1279 = vmatprep.subr.bf16.mxu1 %v1278_v17  ;;  %v601_v17 = vld [vmem:[#allocation10 + $0x1d8] sm:$0xff] }
 0x2cd   :  { %v1318_v22 = vpack.c.bf16 %v601_v17, %v600_v16  ;;  %v635_v16 = vld [vmem:[#allocation10 + $0x2e8] sm:$0xff] }
 0x2cf   :  { %1281 = vmatpush3.bf16.msra.mxu1 %v1280_v25  ;;  %v1330_v25 = vpack.c.bf16 %v623_v19, %v622_v18  ;;  %v1354_v18 = vpack.c.bf16 %v635_v16, %v634_v15  ;;  %v618_v19 = vld [vmem:[#allocation10 + $0x260] sm:$0xff] }
 0x2d0   :  { %1283 = vmatprep.subr.bf16.mxu1 %v1282_v28  ;;  %v625_v28 = vld [vmem:[#allocation10 + $0x298] sm:$0xff] }
 0x2d1   :  { %v1334_v63 = vpack.c.bf16 %v625_v28, %v624_v57  ;;  %v636_v57 = vld [vmem:[#allocation10 + $0x2f0] sm:$0xff]  ;;  %v637_v28 = vld [vmem:[#allocation10 + $0x2f8] sm:$0xff] }
 0x2d3   :  { %1285 = vmatpush3.bf16.msra.mxu1 %v1284_v35  ;;  %v609_v35 = vld [vmem:[#allocation10 + $0x218] sm:$0xff] }
 0x2d4   :  { %1287 = vmatprep.subr.bf16.mxu1 %v1286_v43  ;;  %v537_v43 = vld [vmem:[#allocation2 + $0x58] sm:$0xff] }
 0x2d7   :  { %1289 = vmatpush3.bf16.msra.mxu1 %v1288_v56  ;;  %v629_v56 = vld [vmem:[#allocation10 + $0x2b8] sm:$0xff] }
 0x395   :  { %v997_v47 = vpop.f32.mrb[0].mxu1 }
 0x396   :  { %v998_v49 = vpop.f32.mrb[1].mxu1 }
 0x397   :  { %v999_v50 = vadd.f32 %v998_v49, %v997_v47  ;;  %v579_v47 = vld [vmem:[#allocation10 + $0x128] sm:$0xff] }
 0x398   :  { %v571_v49 = vld [vmem:[#allocation10 + $0xe8] sm:$0xff] }
 0x399   :  { %v1748_v51 = vadd.f32 %v999_v50, %v409_v48  ;;  %v1000_v52 = vpop.f32.mrb[2].mxu1  ;;  %v1306_v50 = vpack.c.bf16 %v595_v44, %v594_v42  ;;  %v627_v42 = vld [vmem:[#allocation10 + $0x2a8] sm:$0xff]  ;;  %v1324_v44 = vpack.c.bf16 %v587_v34, %v586_v0  ;;  %v532_v0 = vld [vmem:[#allocation2 + $0x20] sm:$0xff]  ;;  %v534_v34 = vld [vmem:[#allocation2 + $0x30] sm:$0xff] }
 0x39a   :  { %v1001_v53 = vpop.f32.mrb[3].mxu1 }
 0x39b   :  { %485 = vadd.xlane.f32.xlu0 %v1748_v51  ;;  %v1002_v54 = vadd.f32 %v1001_v53, %v1000_v52  ;;  %v1308_v52 = vpack.c.bf16 %v579_v47, %v578_v45  ;;  %v596_v53 = vld [vmem:[#allocation10 + $0x1b0] sm:$0xff]  ;;  %1307 = vmatprep.subr.bf16.mxu0 %v1306_v50  ;;  %v1336_v45 = vpack.c.bf16 %v609_v35, %v608_v32  ;;  %v198_v35 = vld [vmem:[#allocation8 + $0x8] sm:$0xff] }
 0x39c   :  { %v1326_v47 = vpack.c.bf16 %v605_v40, %v604_v36  ;;  %v1338_v50 = vpack.c.bf16 %v627_v42, %v626_v41  ;;  %v199_v40 = vld [vmem:[#allocation8 + $0x10] sm:$0xff]  ;;  %v200_v41 = vld [vmem:[#allocation8 + $0x18] sm:$0xff] }
 0x39d   :  { %v1751_v55 = vadd.f32 %v1002_v54, %v409_v48  ;;  %v570_v48 = vld [vmem:[#allocation10 + $0xe0] sm:$0xff]  ;;  %v597_v54 = vld [vmem:[#allocation10 + $0x1b8] sm:$0xff]  ;;  %1309 = vmatpush3.bf16.msra.mxu0 %v1308_v52  ;;  %v1366_v42 = vpack.c.bf16 %v200_v41, %v199_v40 }
 0x39e   :  { %v1310_v59 = vpack.c.bf16 %v597_v54, %v596_v53  ;;  %v1290_v62 = vpack.c.bf16 %v571_v49, %v570_v48  ;;  %v588_v48 = vld [vmem:[#allocation10 + $0x170] sm:$0xff]  ;;  %v589_v49 = vld [vmem:[#allocation10 + $0x178] sm:$0xff]  ;;  %v610_v52 = vld [vmem:[#allocation10 + $0x220] sm:$0xff] }
 0x39f   :  { %487 = vadd.xlane.f32.xlu1 %v1751_v55  ;;  %v611_v53 = vld [vmem:[#allocation10 + $0x228] sm:$0xff]  ;;  %v628_v54 = vld [vmem:[#allocation10 + $0x2b0] sm:$0xff] }
 0x3a0   :  { %1311 = vmatprep.subr.bf16.mxu0 %v1310_v59  ;;  %1291 = vmatprep.subr.bf16.mxu1 %v1290_v62  ;;  %v1328_v59 = vpack.c.bf16 %v589_v49, %v588_v48  ;;  %v1340_v60 = vpack.c.bf16 %v611_v53, %v610_v52  ;;  %v1342_v61 = vpack.c.bf16 %v629_v56, %v628_v54  ;;  %v612_v62 = vld [vmem:[#allocation10 + $0x230] sm:$0xff]  ;;  %v204_v48 = vld [vmem:[#allocation8 + $0x38] sm:$0xff]  ;;  %v206_v52 = vld [vmem:[#allocation8 + $0x48] sm:$0xff] }
 0x3a1   :  { %1313 = vmatpush3.bf16.msra.mxu0 %v1312_v8  ;;  %1293 = vmatpush3.bf16.msra.mxu1 %v1292_v9  ;;  %v1344_v5 = vpack.c.bf16 %v613_v2, %v612_v62  ;;  %v615_v8 = vld [vmem:[#allocation10 + $0x248] sm:$0xff]  ;;  %v632_v9 = vld [vmem:[#allocation10 + $0x2d0] sm:$0xff]  ;;  %v538_v56 = vld [vmem:[#allocation2 + $0x60] sm:$0xff] }
 0x3a2   :  { %1315 = vmatprep.subr.bf16.mxu0 %v1314_v11  ;;  %1295 = vmatprep.subr.bf16.mxu1 %v1294_v14  ;;  %v1348_v11 = vpack.c.bf16 %v615_v8, %v614_v7  ;;  %v1350_v12 = vpack.c.bf16 %v633_v10, %v632_v9  ;;  %v617_v14 = vld [vmem:[#allocation10 + $0x258] sm:$0xff]  ;;  %v539_v53 = vld [vmem:[#allocation2 + $0x68] sm:$0xff]  ;;  %v540_v62 = vld [vmem:[#allocation2 + $0x70] sm:$0xff] }
 0x3a3   :  { %v1352_v17 = vpack.c.bf16 %v617_v14, %v616_v13  ;;  %v212_v7 = vld [vmem:[#allocation8 + $0x78] sm:$0xff] }
 0x3a5   :  { %1317 = vmatpush3.bf16.msra.mxu0 %v1316_v20  ;;  %1297 = vmatpush3.bf16.msra.mxu1 %v1296_v21  ;;  %v619_v20 = vld [vmem:[#allocation10 + $0x268] sm:$0xff] }
 0x3a6   :  { %1319 = vmatprep.subr.bf16.mxu0 %v1318_v22  ;;  %1331 = vmatprep.subr.bf16.mxu1 %v1330_v25  ;;  %v1356_v21 = vpack.c.bf16 %v619_v20, %v618_v19 }
 0x3a8   :  { %703 = vmatmul.mubr.f32.vlgmr.msra.gmra.mrb[4].mxu1 %v530_v29  ;;  %v1358_v29 = vpack.c.bf16 %v637_v28, %v636_v57 }
 0x3a9   :  { %1321 = vmatpush3.bf16.msra.mxu0 %v1320_v30  ;;  %1333 = vmatpush3.bf16.msra.mxu1 %v1332_v31  ;;  %v620_v30 = vld [vmem:[#allocation10 + $0x270] sm:$0xff]  ;;  %v621_v31 = vld [vmem:[#allocation10 + $0x278] sm:$0xff] }
 0x3aa   :  { %1323 = vmatprep.subr.bf16.mxu0 %v1322_v33  ;;  %1335 = vmatprep.subr.bf16.mxu1 %v1334_v63  ;;  %v1360_v32 = vpack.c.bf16 %v621_v31, %v620_v30  ;;  %v533_v33 = vld [vmem:[#allocation2 + $0x28] sm:$0xff]  ;;  %v197_v63 = vld [vmem:[#allocation8] sm:$0xff] }
 0x3ab   :  { %707 = vmatprep.mubr.f32.mxu1 %v537_v43  ;;  %777 = vmatprep.mubr.f32.mxu0 %v533_v33  ;;  %v1362_v36 = vpack.c.bf16 %v198_v35, %v197_v63  ;;  %v201_v43 = vld [vmem:[#allocation8 + $0x20] sm:$0xff] }
 0x3ad   :  { %1325 = vmatpush3.bf16.msra.mxu0 %v1324_v44  ;;  %1337 = vmatpush3.bf16.msra.mxu1 %v1336_v45  ;;  %v202_v44 = vld [vmem:[#allocation8 + $0x28] sm:$0xff] }
 0x3ae   :  { %1327 = vmatprep.subr.bf16.mxu0 %v1326_v47  ;;  %1339 = vmatprep.subr.bf16.mxu1 %v1338_v50  ;;  %v1370_v45 = vpack.c.bf16 %v202_v44, %v201_v43  ;;  %v203_v47 = vld [vmem:[#allocation8 + $0x30] sm:$0xff]  ;;  %v205_v50 = vld [vmem:[#allocation8 + $0x40] sm:$0xff] }
 0x3af   :  { %v1374_v49 = vpack.c.bf16 %v204_v48, %v203_v47  ;;  %v1378_v54 = vpack.c.bf16 %v206_v52, %v205_v50 }
 0x3b1   :  { %1329 = vmatpush3.bf16.msra.mxu0 %v1328_v59  ;;  %1341 = vmatpush3.bf16.msra.mxu1 %v1340_v60  ;;  %v541_v59 = vld [vmem:[#allocation2 + $0x78] sm:$0xff]  ;;  %v207_v60 = vld [vmem:[#allocation8 + $0x50] sm:$0xff] }
 0x3b2   :  { %1343 = vmatprep.subr.bf16.mxu1 %v1342_v61  ;;  %1363 = vmatprep.subr.bf16.mxu0 %v1362_v36  ;;  %v208_v61 = vld [vmem:[#allocation8 + $0x58] sm:$0xff] }
 0x3b3   :  { %v1382_v2 = vpack.c.bf16 %v208_v61, %v207_v60 }
 0x3b4   :  { %778 = vmatmul.mubr.f32.vlgmr.msra.gmra.mrb[4].mxu0 %v532_v0 }
 0x3b5   :  { %1345 = vmatpush3.bf16.msra.mxu1 %v1344_v5  ;;  %1365 = vmatpush3.bf16.msra.mxu0 %v1362_v36  ;;  %v1386_v5 = vpack.c.bf16 %v210_v3, %v209_v38 }
 0x3b6   :  { %1347 = vmatprep.subr.bf16.mxu1 %v1346_v6  ;;  %1367 = vmatprep.subr.bf16.mxu0 %v1366_v42  ;;  %v211_v6 = vld [vmem:[#allocation8 + $0x70] sm:$0xff] }
 0x3b7   :  { %782 = vmatprep.mubr.f32.mxu0 %v539_v53  ;;  %v1390_v8 = vpack.c.bf16 %v212_v7, %v211_v6  ;;  %v940_v53 = vsub.s32 3, %v1687_v37 }
 0x3b8   :  { %783 = vmatmul.mubr.f32.gmra.mrb[6].mxu0 %v538_v56 }
 0x3b9   :  { %1349 = vmatpush3.bf16.msra.mxu1 %v1348_v11  ;;  %1369 = vmatpush3.bf16.msra.mxu0 %v1366_v42 }
 0x3ba   :  { %1351 = vmatprep.subr.bf16.mxu1 %v1350_v12  ;;  %1371 = vmatprep.subr.bf16.mxu0 %v1370_v45 }
 0x3bd   :  { %1353 = vmatpush3.bf16.msra.mxu1 %v1352_v17  ;;  %1373 = vmatpush3.bf16.msra.mxu0 %v1370_v45 }
 0x3be   :  { %1355 = vmatprep.subr.bf16.mxu1 %v1354_v18  ;;  %1375 = vmatprep.subr.bf16.mxu0 %v1374_v49  ;;  %v511_v18 = vrot.slane %v1744_v46, %v1720_v1 }
 0x3c1   :  { %1357 = vmatpush3.bf16.msra.mxu1 %v1356_v21  ;;  %1377 = vmatpush3.bf16.msra.mxu0 %v1374_v49  ;;  %v517_v21 = vrot.slane %v1744_v46, %v1724_v4 }
 0x3c2   :  { %1359 = vmatprep.subr.bf16.mxu1 %v1358_v29  ;;  %1379 = vmatprep.subr.bf16.mxu0 %v1378_v54 }
 0x3c5   :  { %1361 = vmatpush3.bf16.msra.mxu1 %v1360_v32  ;;  %1381 = vmatpush3.bf16.msra.mxu0 %v1378_v54  ;;  %v941_v54 = vrot.slane %v1744_v46, %v940_v53 }
 0x3c6   :  { %1383 = vmatprep.subr.bf16.mxu0 %v1382_v2 }
 0x3c9   :  { %1385 = vmatpush3.bf16.msra.mxu0 %v1382_v2 }
 0x3ca   :  { %1387 = vmatprep.subr.bf16.mxu0 %v1386_v5 }
 0x3cd   :  { %1389 = vmatpush3.bf16.msra.mxu0 %v1386_v5 }
 0x3ce   :  { %1391 = vmatprep.subr.bf16.mxu0 %v1390_v8 }
 0x3d1   :  { %1393 = vmatpush3.bf16.msra.mxu0 %v1390_v8 }
 0x428   :  { %v486_v39 = vpop.xlane.xlu0 %485 }
 0x429   :  { %v490_v22 = vmul.f32 0.0078125, %v486_v39 }
 0x42b   :  { %v1755_v23 = vsub.f32 %v1748_v51, %v490_v22  ;;  %v536_v51 = vld [vmem:[#allocation2 + $0x50] sm:$0xff] }
 0x42c   :  { %v488_v24 = vpop.xlane.xlu1 %487  ;;  %708 = vmatmul.mubr.f32.gmra.mrb[6].mxu1 %v536_v51 }
 0x42d   :  { %v494_v25 = vmul.f32 %v1755_v23, %v1755_v23  ;;  %v491_v26 = vmul.f32 0.0078125, %v488_v24 }
 0x42f   :  { %496 = vadd.xlane.f32.xlu0 %v494_v25  ;;  %v1760_v58 = vsub.f32 %v1751_v55, %v491_v26  ;;  %v535_v55 = vld [vmem:[#allocation2 + $0x38] sm:$0xff] }
 0x430   :  { %852 = vmatprep.mubr.f32.mxu1 %v535_v55 }
 0x431   :  { %v495_v27 = vmul.f32 %v1760_v58, %v1760_v58  ;;  %853 = vmatmul.mubr.f32.vlgmr.msra.gmra.mrb[8].mxu1 %v534_v34 }
 0x432   :  { %857 = vmatprep.mubr.f32.mxu1 %v541_v59 }
 0x433   :  { %498 = vadd.xlane.f32.xlu1 %v495_v27 }
 0x435   :  { %858 = vmatmul.mubr.f32.gmra.mrb[10].mxu1 %v540_v62 }
 0x47b   :  { %v1035_v9 = vpop.f32.mrb[4].mxu1 }
 0x47c   :  { %v1036_v10 = vpop.f32.mrb[5].mxu1 }
 0x47d   :  { %v1037_v11 = vadd.f32 %v1036_v10, %v1035_v9 }
 0x487   :  { %v1073_v55 = vpop.f32.mrb[4].mxu0 }
 0x488   :  { %v1074_v34 = vpop.f32.mrb[5].mxu0 }
 0x489   :  { %v1075_v63 = vadd.f32 %v1074_v34, %v1073_v55 }
 0x48b   :  { %v780_v40 = vadd.f32 %v1075_v63, %v1037_v11  ;;  %v1076_v43 = vpop.f32.mrb[6].mxu0 }
 0x48c   :  { %v1077_v44 = vpop.f32.mrb[7].mxu0 }
 0x48d   :  { %v1078_v45 = vadd.f32 %v1077_v44, %v1076_v43 }
 0x4bc   :  { %v497_v12 = vpop.xlane.xlu0 %496 }
 0x4bd   :  { %v500_v13 = vmul.f32 0.0078125, %v497_v12 }
 0x4bf   :  { %v502_v14 = vadd.f32 1e-05, %v500_v13 }
 0x4c0   :  { %v499_v15 = vpop.xlane.xlu1 %498 }
 0x4c1   :  { %1418 = vrsqrt.f32 %v502_v14  ;;  %v501_v16 = vmul.f32 0.0078125, %v499_v15 }
 0x4c3   :  { %v503_v17 = vadd.f32 1e-05, %v501_v16 }
 0x4c5   :  { %1420 = vrsqrt.f32 %v503_v17 }
 0x4cb   :  { %v1419_v19 = vpop.eup %1418 }
 0x4cc   :  { %v506_v20 = vmul.f32 %v1419_v19, %v1755_v23 }
 0x4ce   :  { %v512_v39 = vmul.f32 %v511_v18, %v506_v20 }
 0x4cf   :  { %v1421_v22 = vpop.eup %1420 }
 0x4d0   :  { %v518_v24 = vadd.f32 %v517_v21, %v512_v39  ;;  %v507_v25 = vmul.f32 %v1421_v22, %v1760_v58 }
 0x4d2   :  { %v522_v26 = vmul.f32 0.70710677, %v518_v24  ;;  %v513_v27 = vmul.f32 %v511_v18, %v507_v25  ;;  %v520_v30 = vmul.f32 0.5, %v518_v24 }
 0x4d4   :  { %1422 = verf.f32 %v522_v26  ;;  %v519_v57 = vadd.f32 %v517_v21, %v513_v27 }
 0x4d6   :  { %v523_v28 = vmul.f32 0.70710677, %v519_v57  ;;  %v521_v23 = vmul.f32 0.5, %v519_v57 }
 0x4d8   :  { %1424 = verf.f32 %v523_v28 }
 0x4de   :  { %v1423_v29 = vpop.eup %1422 }
 0x4df   :  { %v526_v1 = vadd.f32 1.0, %v1423_v29 }
 0x4e1   :  { %v528_v31 = vmul.f32 %v526_v1, %v520_v30 }
 0x4e2   :  { %v1425_v51 = vpop.eup %1424 }
 0x4e3   :  { %1167 = vmatprep.mubr.f32.mxu0 %v528_v31  ;;  %v527_v32 = vadd.f32 1.0, %v1425_v51 }
 0x4e5   :  { %v529_v4 = vmul.f32 %v527_v32, %v521_v23 }
 0x4e7   :  { %1168 = vmatmul.mubr.f32.vlgmr.msra.gmra.mrb[8].mxu0 %v529_v4 }
 0x4ff   :  { %v1038_v33 = vpop.f32.mrb[6].mxu1 }
 0x500   :  { %v1039_v0 = vpop.f32.mrb[7].mxu1 }
 0x501   :  { %v1040_v58 = vadd.f32 %v1039_v0, %v1038_v33 }
 0x503   :  { %v785_v49 = vadd.f32 %v1078_v45, %v1040_v58 }
 0x504   :  { %v1111_v35 = vpop.f32.mrb[8].mxu1 }
 0x505   :  { %v1112_v36 = vpop.f32.mrb[9].mxu1 }
 0x506   :  { %v1113_v41 = vadd.f32 %v1112_v36, %v1111_v35 }
 0x508   :  { %v855_v42 = vadd.f32 %v1113_v41, %v780_v40  ;;  %v1114_v47 = vpop.f32.mrb[10].mxu1 }
 0x509   :  { %v1115_v48 = vpop.f32.mrb[11].mxu1 }
 0x50a   :  { %v1116_v50 = vadd.f32 %v1115_v48, %v1114_v47 }
 0x50c   :  { %v860_v52 = vadd.f32 %v1116_v50, %v785_v49 }
 0x5ba   :  { %v1169_v56 = vpop.f32.mrb[8].mxu0 }
 0x5bb   :  { %v935_v59 = vadd.f32 %v1169_v56, %v860_v52  ;;  %v929_v60 = vpop.f32.mrb[9].mxu0 }
 0x5bc   :  { %v930_v61 = vadd.f32 %v929_v60, %v855_v42 }
 0x5bd   :  { %v943_v62 = vadd.f32 %v941_v54, %v935_v59 }
 0x5be   :  { %v942_v2 = vadd.f32 %v941_v54, %v930_v61 }
 0x5bf   :  { %945 = vst [vmem:[#allocation11 + $0x8] sm:$0xff] %v943_v62 }
 0x5c0   :  { %944 = vst [vmem:[#allocation11] sm:$0xff] %v942_v2 }
 0x5c1   :  { %1547 = shalt.err (!%p1544_p2)
}
 0x5c2   :  { %s1548_s24 = scalar_lea.hbm %s1794_s7, 256 }
 0x5c3   :  { %p1549_p3 = scmp.ne.s32.totalorder %s1794_s7, %s1548_s24  ;;  %p1552_p4 = scmp.lt.u32.totalorder %s1548_s24, %s1794_s7 }
 0x5c5   :  { %p1554_p5 = pnand %p1552_p4, %p1549_p3 }
 0x5c7   :  { %1557 = shalt.err (!%p1554_p5)
}
 0x5c8   :  { %957 = dma.vmem_to_hbm [thread:$0]  %s952_s20, 256, %s1794_s7, [#allocation4], %s1571_s25, %s1571_s25, %s1572_s27  }
 0x5c9   :  { %1564 = dma.done.wait [#allocation4], 256  }
 0x5ca   :  { %1565 = vsyncadd [#allocation4], 4294967040 }
 0x5cb   :  { %961 = vsyncpa [#allocation3], 1 }
 0x5cc   :  { %962 = vsyncpa [#allocation6], 1 }
 0x5cd   :  { %963 = vsyncpa [#allocation9], 1 }
 0x5ce   :  { %964 = vsyncpa [#allocation4], 1 }

</bundles_post_ra>
